<compile_context>
chip_gen: v5e
topology: v5e:2x2
jax: 0.10.0
libtpu: 0.0.40
codegen_flags: <defaults>
</compile_context>

<pallas_src>
import functools

import jax
import jax.numpy as jnp
from jax.experimental import pallas as pl
from jax.experimental.pallas import tpu as pltpu

_LN_EPS = 1e-5                      # torch.nn.LayerNorm default

_ROW_TILE_TARGET = 512              # token-row tiles for the GEMM kernels
_Q_TILE_TARGET = 256                # flash q tile
_KV_TILE_TARGET = 512               # flash kv tile
_MLP_TILE_TARGET = 512              # FFN hidden-dim reduction tile

_VMEM_LIMIT_CACHE = None


def _vmem_limit():
    """Per-generation VMEM budget: ~3/4 of physical, capped at 96 MiB."""
    global _VMEM_LIMIT_CACHE
    if _VMEM_LIMIT_CACHE is None:
        limit = 64 * 1024 * 1024
        try:
            cap = getattr(pltpu.get_tpu_info(), "vmem_capacity_bytes", None)
            if cap:
                limit = min(int(cap) * 3 // 4, 96 * 1024 * 1024)
        except Exception:
            pass
        _VMEM_LIMIT_CACHE = limit
    return _VMEM_LIMIT_CACHE


def _cparams(dim_semantics):
    return pltpu.CompilerParams(dimension_semantics=tuple(dim_semantics),
                                vmem_limit_bytes=_vmem_limit())


def _row_tile(num_rows, dtype, target=_ROW_TILE_TARGET):
    """Dtype-aware row tile (multiple of sublane packing); ragged tail via cdiv."""
    pack = max(8, 32 // jnp.dtype(dtype).itemsize)     # 8 f32, 16 bf16, 32 int8
    if num_rows <= target:
        return num_rows
    for tm in range(target, pack - 1, -1):
        if num_rows % tm == 0 and tm % pack == 0:
            return tm
    return target   # no aligned divisor: ragged last block (masked stores)


def _seq_tile(length, target):
    """Tile of the sequence axis that divides it exactly (needed for softmax)."""
    if length <= target:
        return length
    for t in range(target, 7, -1):
        if length % t == 0 and t % 8 == 0:
            return t
    return length   # awkward length: fall back to the full (always legal) block


def _mlp_tile(dim_mlp, target=_MLP_TILE_TARGET):
    if dim_mlp <= target:
        return dim_mlp
    for t in range(target, 127, -128):                 # multiples of 128 only
        if dim_mlp % t == 0:
            return t
    return dim_mlp


def _heads_per_group(num_heads, d_qk_h, d_v_h):
    """Smallest head group whose q/k/v/out lane width is a multiple of 128."""
    for g in range(1, num_heads + 1):
        if (num_heads % g == 0 and (g * d_qk_h) % 128 == 0
                and (g * d_v_h) % 128 == 0):
            return g
    return num_heads   # full width == array dim: always a legal (and dense) block


# ---------------------------------------------------------------------------
# One-time parameter preparation (hoisted out of the forward pass).
# ---------------------------------------------------------------------------
def prepare_params(raw_params):
    prepared = []
    for p in raw_params:
        dim_qk = p["wq"].shape[1]
        scale = jnp.asarray(1.0 / (dim_qk ** 0.5), p["wq"].dtype)
        prepared.append(dict(
            wq=p["wq"] * scale, bq=(p["bq"] * scale)[None, :],   # scale folded in
            wk=p["wk"], bk=p["bk"][None, :],
            wv=p["wv"], bv=p["bv"][None, :],
            w1=p["w1"], b1=p["b1"][None, :],
            w2=p["w2"], b2=p["b2"][None, :],
            gamma=p["gamma"][None, :], beta=p["beta"][None, :]))
    return prepared


# ---------------------------------------------------------------------------
# Kernel 1: QKV projection.  One x block is read once and drives three GEMMs;
# q/k/v come out as separate lane-dense 2-D activations (no concat, no slices).
# ---------------------------------------------------------------------------
def _qkv_kernel(x_ref, wq_ref, wk_ref, wv_ref, bq_ref, bk_ref, bv_ref,
                q_ref, k_ref, v_ref):
    x = x_ref[...]
    q = jnp.dot(x, wq_ref[...], preferred_element_type=jnp.float32)
    q_ref[...] = (q + bq_ref[...].astype(jnp.float32)).astype(q_ref.dtype)
    k = jnp.dot(x, wk_ref[...], preferred_element_type=jnp.float32)
    k_ref[...] = (k + bk_ref[...].astype(jnp.float32)).astype(k_ref.dtype)
    v = jnp.dot(x, wv_ref[...], preferred_element_type=jnp.float32)
    v_ref[...] = (v + bv_ref[...].astype(jnp.float32)).astype(v_ref.dtype)


def _qkv_projection(x2d, p):
    T, D = x2d.shape
    dqk = p["wq"].shape[1]
    dv = p["wv"].shape[1]
    tm = _row_tile(T, x2d.dtype)
    return pl.pallas_call(
        _qkv_kernel,
        out_shape=(jax.ShapeDtypeStruct((T, dqk), x2d.dtype),
                   jax.ShapeDtypeStruct((T, dqk), x2d.dtype),
                   jax.ShapeDtypeStruct((T, dv), x2d.dtype)),
        grid=(pl.cdiv(T, tm),),
        in_specs=[
            pl.BlockSpec((tm, D), lambda i: (i, 0)),
            pl.BlockSpec((D, dqk), lambda i: (0, 0)),
            pl.BlockSpec((D, dqk), lambda i: (0, 0)),
            pl.BlockSpec((D, dv), lambda i: (0, 0)),
            pl.BlockSpec((1, dqk), lambda i: (0, 0)),
            pl.BlockSpec((1, dqk), lambda i: (0, 0)),
            pl.BlockSpec((1, dv), lambda i: (0, 0)),
        ],
        out_specs=(pl.BlockSpec((tm, dqk), lambda i: (i, 0)),
                   pl.BlockSpec((tm, dqk), lambda i: (i, 0)),
                   pl.BlockSpec((tm, dv), lambda i: (i, 0))),
        compiler_params=_cparams(("parallel",)),
    )(x2d, p["wq"], p["wk"], p["wv"], p["bq"], p["bk"], p["bv"])


# ---------------------------------------------------------------------------
# Kernel 2: flash attention over the flat [B*L, features] activations.
# Grid = (batch, head_group, q_tile, kv_tile); kv axis trailing / "arbitrary".
# q arrives pre-scaled (1/sqrt(dim_qk) folded into Wq).  Heads of a group are
# contiguous lane slices, so every HBM-facing block is lane-dense and the
# attention output lands directly in the [token, dim_v] layout (no transposes).
# ---------------------------------------------------------------------------
def _attention_kernel(q_ref, k_ref, v_ref, o_ref, m_ref, l_ref, acc_ref,
                      *, heads_per_group, d_qk_h, d_v_h):
    ki = pl.program_id(3)

    @pl.when(ki == 0)
    def _():
        m_ref[...] = jnp.full_like(m_ref, -jnp.inf)
        l_ref[...] = jnp.zeros_like(l_ref)
        acc_ref[...] = jnp.zeros_like(acc_ref)

    for h in range(heads_per_group):                   # short static loop (G small)
        qs = slice(h * d_qk_h, (h + 1) * d_qk_h)
        vs = slice(h * d_v_h, (h + 1) * d_v_h)
        q = q_ref[:, qs]                               # (tq, d_qk_h)
        k = k_ref[:, qs]                               # (tkv, d_qk_h)
        v = v_ref[:, vs]                               # (tkv, d_v_h)

        # Contract the head dim of q and k directly (no k.T / XLU copy).
        s = jax.lax.dot_general(q, k, (((1,), (1,)), ((), ())),
                                preferred_element_type=jnp.float32)   # (tq, tkv)

        m_prev = m_ref[h]                              # (tq, 1)
        l_prev = l_ref[h]
        m_new = jnp.maximum(m_prev, jnp.max(s, axis=-1, keepdims=True))
        alpha = jnp.exp(m_prev - m_new)
        p = jnp.exp(s - m_new)
        l_ref[h] = alpha * l_prev + jnp.sum(p, axis=-1, keepdims=True)
        m_ref[h] = m_new
        acc_ref[:, vs] = alpha * acc_ref[:, vs] + jnp.dot(
            p.astype(v.dtype), v, preferred_element_type=jnp.float32)

    @pl.when(ki == pl.num_programs(3) - 1)
    def _():
        cols = []
        for h in range(heads_per_group):
            vs = slice(h * d_v_h, (h + 1) * d_v_h)
            inv = pl.reciprocal(l_ref[h], approx=False)   # exact: parity w/ torch
            cols.append(acc_ref[:, vs] * inv)
        # Single dense store of the whole (tq, G*d_v_h) block.
        o_ref[...] = jnp.concatenate(cols, axis=-1).astype(o_ref.dtype)


def _attention(q2d, k2d, v2d, *, batch, seq, num_heads, d_qk_h, d_v_h):
    T = batch * seq
    dim_v = num_heads * d_v_h
    g = _heads_per_group(num_heads, d_qk_h, d_v_h)
    hg = num_heads // g
    bw_qk = g * d_qk_h
    bw_v = g * d_v_h
    tq = _seq_tile(seq, _Q_TILE_TARGET)
    tkv = _seq_tile(seq, _KV_TILE_TARGET)
    nqt = seq // tq
    nkt = seq // tkv

    kernel = functools.partial(_attention_kernel, heads_per_group=g,
                               d_qk_h=d_qk_h, d_v_h=d_v_h)
    return pl.pallas_call(
        kernel,
        out_shape=jax.ShapeDtypeStruct((T, dim_v), q2d.dtype),
        grid=(batch, hg, nqt, nkt),
        in_specs=[
            pl.BlockSpec((tq, bw_qk), lambda b, gg, qi, ki: (b * nqt + qi, gg)),
            pl.BlockSpec((tkv, bw_qk), lambda b, gg, qi, ki: (b * nkt + ki, gg)),
            pl.BlockSpec((tkv, bw_v), lambda b, gg, qi, ki: (b * nkt + ki, gg)),
        ],
        out_specs=pl.BlockSpec((tq, bw_v), lambda b, gg, qi, ki: (b * nqt + qi, gg)),
        scratch_shapes=[
            pltpu.VMEM((g, tq, 1), jnp.float32),       # running max  (per head)
            pltpu.VMEM((g, tq, 1), jnp.float32),       # running sum  (per head)
            pltpu.VMEM((tq, bw_v), jnp.float32),       # output accumulator
        ],
        compiler_params=_cparams(("parallel", "parallel", "parallel", "arbitrary")),
    )(q2d, k2d, v2d)


# ---------------------------------------------------------------------------
# Kernel 3: encoder-layer tail:  x = attn + attn;  x = FFN(x) + x;  LayerNorm.
# The FFN hidden dim is an in-kernel reduction grid axis (f32 accumulator), so
# only (D, tk) / (tk, D) weight slabs are resident at once.
# ---------------------------------------------------------------------------
def _ffn_ln_kernel(x_ref, w1_ref, b1_ref, w2_ref, b2_ref, g_ref, beta_ref,
                   o_ref, acc_ref):
    j = pl.program_id(1)

    @pl.when(j == 0)
    def _():
        acc_ref[...] = jnp.zeros_like(acc_ref)

    x2 = x_ref[...] * 2                                # "x = x + x" (exact)
    h = jnp.dot(x2, w1_ref[...], preferred_element_type=jnp.float32)
    h = h + b1_ref[...].astype(jnp.float32)
    h = jax.nn.gelu(h, approximate=True)
    acc_ref[...] += jnp.dot(h.astype(x_ref.dtype), w2_ref[...],
                            preferred_element_type=jnp.float32)

    @pl.when(j == pl.num_programs(1) - 1)
    def _():
        y = acc_ref[...] + b2_ref[...].astype(jnp.float32) + x2.astype(jnp.float32)
        mu = jnp.mean(y, axis=-1, keepdims=True)
        var = jnp.mean(jnp.square(y - mu), axis=-1, keepdims=True)
        y_n = (y - mu) * jax.lax.rsqrt(var + _LN_EPS)
        o_ref[...] = (y_n * g_ref[...].astype(jnp.float32)
                      + beta_ref[...].astype(jnp.float32)).astype(o_ref.dtype)


def _ffn_layernorm(x2d, p):
    T, D = x2d.shape
    dim_mlp = p["w1"].shape[1]
    tm = _row_tile(T, x2d.dtype)
    tk = _mlp_tile(dim_mlp)
    return pl.pallas_call(
        _ffn_ln_kernel,
        out_shape=jax.ShapeDtypeStruct((T, D), x2d.dtype),
        grid=(pl.cdiv(T, tm), dim_mlp // tk),
        in_specs=[
            pl.BlockSpec((tm, D), lambda i, j: (i, 0)),
            pl.BlockSpec((D, tk), lambda i, j: (0, j)),
            pl.BlockSpec((1, tk), lambda i, j: (0, j)),
            pl.BlockSpec((tk, D), lambda i, j: (j, 0)),
            pl.BlockSpec((1, D), lambda i, j: (0, 0)),
            pl.BlockSpec((1, D), lambda i, j: (0, 0)),
            pl.BlockSpec((1, D), lambda i, j: (0, 0)),
        ],
        out_specs=pl.BlockSpec((tm, D), lambda i, j: (i, 0)),
        scratch_shapes=[pltpu.VMEM((tm, D), jnp.float32)],
        compiler_params=_cparams(("parallel", "arbitrary")),
    )(x2d, p["w1"], p["b1"], p["w2"], p["b2"], p["gamma"], p["beta"])


# ---------------------------------------------------------------------------
# Wrappers
# ---------------------------------------------------------------------------
def transformer_encoder_layer(x, p, *, num_heads):
    B, L, D = x.shape
    dim_qk = p["wq"].shape[1]
    dim_v = p["wv"].shape[1]
    assert dim_v == D, "dim_v must equal dim for the residual / LayerNorm path"
    assert dim_qk % num_heads == 0 and dim_v % num_heads == 0

    T = B * L
    x2d = x.reshape(T, D)
    q2d, k2d, v2d = _qkv_projection(x2d, p)
    attn2d = _attention(q2d, k2d, v2d, batch=B, seq=L, num_heads=num_heads,
                        d_qk_h=dim_qk // num_heads, d_v_h=dim_v // num_heads)
    y2d = _ffn_layernorm(attn2d, p)
    return y2d.reshape(B, L, D)


def transformer_encoder(x, params, *, num_heads):
    for layer_params in params:
        x = transformer_encoder_layer(x, layer_params, num_heads=num_heads)
    return x


# ---------------------------------------------------------------------------
# Pure-JAX reference mirroring the PyTorch forward (operates on RAW params).
# ---------------------------------------------------------------------------
def _encoder_reference(x, params, *, num_heads):
    for p in params:
        B, L, D = x.shape
        dqk = p["wq"].shape[1]
        dv = p["wv"].shape[1]
        H = num_heads
        qp = (x @ p["wq"] + p["bq"]).reshape(B, L, H, dqk // H).transpose(0, 2, 1, 3)
        kp = (x @ p["wk"] + p["bk"]).reshape(B, L, H, dqk // H).transpose(0, 2, 1, 3)
        vp = (x @ p["wv"] + p["bv"]).reshape(B, L, H, dv // H).transpose(0, 2, 1, 3)
        attn = jnp.einsum("bhqd,bhkd->bhqk", qp, kp) / (dqk ** 0.5)
        attn = jax.nn.softmax(attn, axis=-1)
        out = jnp.einsum("bhqk,bhkd->bhqd", attn, vp)
        out = out.transpose(0, 2, 1, 3).reshape(B, L, dv)
        h = out + out                                         # x = x + x
        ff = jax.nn.gelu(h @ p["w1"] + p["b1"], approximate=True) @ p["w2"] + p["b2"]
        h = ff + h
        mu = h.mean(-1, keepdims=True)
        var = ((h - mu) ** 2).mean(-1, keepdims=True)
        x = (h - mu) * jax.lax.rsqrt(var + _LN_EPS) * p["gamma"] + p["beta"]
    return x


def _init_layer(key, dim, mlp_dim, dim_qk, dim_v):
    ks = jax.random.split(key, 12)

    def lin(kw, kb, fan_in, fan_out):
        bound = 1.0 / (fan_in ** 0.5)
        w = jax.random.uniform(kw, (fan_in, fan_out), jnp.float32, -bound, bound)
        b = jax.random.uniform(kb, (fan_out,), jnp.float32, -bound, bound)
        return w, b

    wq, bq = lin(ks[0], ks[1], dim, dim_qk)
    wk, bk = lin(ks[2], ks[3], dim, dim_qk)
    wv, bv = lin(ks[4], ks[5], dim, dim_v)
    w1, b1 = lin(ks[6], ks[7], dim, mlp_dim)
    w2, b2 = lin(ks[8], ks[9], mlp_dim, dim)
    gamma = 1.0 + 0.1 * jax.random.normal(ks[10], (dim,), jnp.float32)
    beta = 0.1 * jax.random.normal(ks[11], (dim,), jnp.float32)
    return dict(wq=wq, bq=bq, wk=wk, bk=bk, wv=wv, bv=bv,
                w1=w1, b1=b1, w2=w2, b2=b2, gamma=gamma, beta=beta)


if __name__ == "__main__":
    B, L, D = 2, 8, 32
    mlp_dim = 64
    num_heads = 4
    num_layers = 2
    dim_qk = D      # module defaults: dim_qk = dim
    dim_v = D       # module defaults: dim_v = dim

    key = jax.random.PRNGKey(0)
    kx, *layer_keys = jax.random.split(key, num_layers + 1)
    x = jax.random.normal(kx, (B, L, D), jnp.float32)
    raw_params = [_init_layer(k, D, mlp_dim, dim_qk, dim_v) for k in layer_keys]
    params = prepare_params(raw_params)      # one-time fold/concat (hoisted)

    run = jax.jit(functools.partial(transformer_encoder, num_heads=num_heads))
    y = run(x, params)
    jax.block_until_ready(y)

    y_ref = _encoder_reference(x, raw_params, num_heads=num_heads)
    assert y.shape == (B, L, D)
    err = float(jnp.max(jnp.abs(y - y_ref)))
    assert jnp.allclose(y, y_ref, atol=1e-3, rtol=1e-3), err

    print("KERNEL_OK")
</pallas_src>

<mosaic_0001>
module attributes {stable_mosaic.version = 11 : i64} {
  func.func @_ffn_ln_kernel(%arg0: i32, %arg1: i32, %arg2: memref<16x32xf32, #tpu.memory_space<vmem>>, %arg3: memref<32x64xf32, #tpu.memory_space<vmem>>, %arg4: memref<1x64xf32, #tpu.memory_space<vmem>>, %arg5: memref<64x32xf32, #tpu.memory_space<vmem>>, %arg6: memref<1x32xf32, #tpu.memory_space<vmem>>, %arg7: memref<1x32xf32, #tpu.memory_space<vmem>>, %arg8: memref<1x32xf32, #tpu.memory_space<vmem>>, %arg9: memref<16x32xf32, #tpu.memory_space<vmem>>, %arg10: memref<16x32xf32, #tpu.memory_space<vmem>>) attributes {dimension_semantics = [#tpu.dimension_semantics<parallel>, #tpu.dimension_semantics<arbitrary>], iteration_bounds = array<i64: 1, 1>, scalar_prefetch = 0 : i64, scratch_operands = 1 : i64, tpu.core_type = #tpu.core_type<tc>, window_params = [{transform_indices = @transform_0, window_bounds = array<i64: 16, 32>}, {transform_indices = @transform_1, window_bounds = array<i64: 32, 64>}, {transform_indices = @transform_2, window_bounds = array<i64: 1, 64>}, {transform_indices = @transform_3, window_bounds = array<i64: 64, 32>}, {pipeline_mode = #tpu.pipeline_mode<synchronous>, transform_indices = @transform_4, window_bounds = array<i64: 1, 32>}, {pipeline_mode = #tpu.pipeline_mode<synchronous>, transform_indices = @transform_5, window_bounds = array<i64: 1, 32>}, {pipeline_mode = #tpu.pipeline_mode<synchronous>, transform_indices = @transform_6, window_bounds = array<i64: 1, 32>}, {transform_indices = @transform_7, window_bounds = array<i64: 16, 32>}]} {
    %c0_i32 = arith.constant 0 : i32
    %0 = arith.cmpi eq, %arg1, %c0_i32 : i32
    %1 = arith.extui %0 : i1 to i32
    %c0_i32_0 = arith.constant 0 : i32
    %2 = arith.cmpi ne, %1, %c0_i32_0 : i32
    scf.if %2 {
      %cst_20 = arith.constant 0.000000e+00 : f32
      %32 = vector.broadcast %cst_20 : f32 to vector<16x32xf32>
      %c0_21 = arith.constant 0 : index
      %c0_22 = arith.constant 0 : index
      %33 = vector.load %arg10[%c0_21, %c0_22] : memref<16x32xf32, #tpu.memory_space<vmem>>, vector<16x32xf32>
      tpu.vector_store %arg10[%c0_21, %c0_22], %32 {strides = array<i32>} : memref<16x32xf32, #tpu.memory_space<vmem>>, vector<16x32xf32>,
    } else {
    }
    %c0 = arith.constant 0 : index
    %c0_1 = arith.constant 0 : index
    %3 = vector.load %arg2[%c0, %c0_1] : memref<16x32xf32, #tpu.memory_space<vmem>>, vector<16x32xf32>
    %cst = arith.constant 2.000000e+00 : f32
    %4 = vector.broadcast %cst : f32 to vector<16x32xf32>
    %5 = arith.mulf %3, %4 : vector<16x32xf32>
    %c0_2 = arith.constant 0 : index
    %c0_3 = arith.constant 0 : index
    %6 = vector.load %arg3[%c0_2, %c0_3] : memref<32x64xf32, #tpu.memory_space<vmem>>, vector<32x64xf32>
    %cst_4 = arith.constant dense<0.000000e+00> : vector<16x64xf32>
    %7 = tpu.matmul %5, %6, %cst_4 {dimension_numbers = #tpu.dot_dimension_numbers<[1], [0], [0], [1], [0, 0, 1, 1], [], []>} : vector<16x32xf32>, vector<32x64xf32>, vector<16x64xf32> -> vector<16x64xf32>
    %c0_5 = arith.constant 0 : index
    %c0_6 = arith.constant 0 : index
    %8 = vector.load %arg4[%c0_5, %c0_6] : memref<1x64xf32, #tpu.memory_space<vmem>>, vector<1x64xf32>
    %9 = vector.broadcast %8 : vector<1x64xf32> to vector<16x64xf32>
    %10 = arith.addf %7, %9 : vector<16x64xf32>
    %11 = arith.mulf %10, %10 : vector<16x64xf32>
    %12 = arith.mulf %10, %11 : vector<16x64xf32>
    %cst_7 = arith.constant 4.471500e-02 : f32
    %13 = vector.broadcast %cst_7 : f32 to vector<16x64xf32>
    %14 = arith.mulf %13, %12 : vector<16x64xf32>
    %15 = arith.addf %10, %14 : vector<16x64xf32>
    %cst_8 = arith.constant 0.797884583 : f32
    %16 = vector.broadcast %cst_8 : f32 to vector<16x64xf32>
    %17 = arith.mulf %16, %15 : vector<16x64xf32>
    %18 = math.tanh %17 : vector<16x64xf32>
    %cst_9 = arith.constant 1.000000e+00 : f32
    %19 = vector.broadcast %cst_9 : f32 to vector<16x64xf32>
    %20 = arith.addf %19, %18 : vector<16x64xf32>
    %cst_10 = arith.constant 5.000000e-01 : f32
    %21 = vector.broadcast %cst_10 : f32 to vector<16x64xf32>
    %22 = arith.mulf %21, %20 : vector<16x64xf32>
    %23 = arith.mulf %10, %22 : vector<16x64xf32>
    %c0_11 = arith.constant 0 : index
    %c0_12 = arith.constant 0 : index
    %24 = vector.load %arg10[%c0_11, %c0_12] : memref<16x32xf32, #tpu.memory_space<vmem>>, vector<16x32xf32>
    %c0_13 = arith.constant 0 : index
    %c0_14 = arith.constant 0 : index
    %25 = vector.load %arg5[%c0_13, %c0_14] : memref<64x32xf32, #tpu.memory_space<vmem>>, vector<64x32xf32>
    %cst_15 = arith.constant dense<0.000000e+00> : vector<16x32xf32>
    %26 = tpu.matmul %23, %25, %cst_15 {dimension_numbers = #tpu.dot_dimension_numbers<[1], [0], [0], [1], [0, 0, 1, 1], [], []>} : vector<16x64xf32>, vector<64x32xf32>, vector<16x32xf32> -> vector<16x32xf32>
    %27 = arith.addf %24, %26 : vector<16x32xf32>
    %c0_16 = arith.constant 0 : index
    %c0_17 = arith.constant 0 : index
    %28 = vector.load %arg10[%c0_16, %c0_17] : memref<16x32xf32, #tpu.memory_space<vmem>>, vector<16x32xf32>
    tpu.vector_store %arg10[%c0_16, %c0_17], %27 {strides = array<i32>} : memref<16x32xf32, #tpu.memory_space<vmem>>, vector<16x32xf32>,
    %c0_i32_18 = arith.constant 0 : i32
    %29 = arith.cmpi eq, %arg1, %c0_i32_18 : i32
    %30 = arith.extui %29 : i1 to i32
    %c0_i32_19 = arith.constant 0 : i32
    %31 = arith.cmpi ne, %30, %c0_i32_19 : i32
    scf.if %31 {
      %c0_20 = arith.constant 0 : index
      %c0_21 = arith.constant 0 : index
      %32 = vector.load %arg10[%c0_20, %c0_21] : memref<16x32xf32, #tpu.memory_space<vmem>>, vector<16x32xf32>
      %c0_22 = arith.constant 0 : index
      %c0_23 = arith.constant 0 : index
      %33 = vector.load %arg6[%c0_22, %c0_23] : memref<1x32xf32, #tpu.memory_space<vmem>>, vector<1x32xf32>
      %34 = vector.broadcast %33 : vector<1x32xf32> to vector<16x32xf32>
      %35 = arith.addf %32, %34 : vector<16x32xf32>
      %36 = arith.addf %35, %5 : vector<16x32xf32>
      %cst_24 = arith.constant dense<0.000000e+00> : vector<16xf32>
      %37 = vector.multi_reduction <add>, %36, %cst_24 [1] : vector<16x32xf32> to vector<16xf32>
      %38 = vector.shape_cast %37 : vector<16xf32> to vector<16x1xf32>
      %cst_25 = arith.constant 3.200000e+01 : f32
      %39 = vector.broadcast %cst_25 : f32 to vector<16x1xf32>
      %40 = arith.divf %38, %39 : vector<16x1xf32>
      %41 = vector.broadcast %40 : vector<16x1xf32> to vector<16x32xf32>
      %42 = arith.subf %36, %41 : vector<16x32xf32>
      %43 = arith.mulf %42, %42 : vector<16x32xf32>
      %cst_26 = arith.constant dense<0.000000e+00> : vector<16xf32>
      %44 = vector.multi_reduction <add>, %43, %cst_26 [1] : vector<16x32xf32> to vector<16xf32>
      %45 = vector.shape_cast %44 : vector<16xf32> to vector<16x1xf32>
      %cst_27 = arith.constant 3.200000e+01 : f32
      %46 = vector.broadcast %cst_27 : f32 to vector<16x1xf32>
      %47 = arith.divf %45, %46 : vector<16x1xf32>
      %48 = vector.broadcast %40 : vector<16x1xf32> to vector<16x32xf32>
      %49 = arith.subf %36, %48 : vector<16x32xf32>
      %cst_28 = arith.constant 9.99999974E-6 : f32
      %50 = vector.broadcast %cst_28 : f32 to vector<16x1xf32>
      %51 = arith.addf %47, %50 : vector<16x1xf32>
      %52 = math.rsqrt %51 : vector<16x1xf32>
      %53 = vector.broadcast %52 : vector<16x1xf32> to vector<16x32xf32>
      %54 = arith.mulf %49, %53 : vector<16x32xf32>
      %c0_29 = arith.constant 0 : index
      %c0_30 = arith.constant 0 : index
      %55 = vector.load %arg7[%c0_29, %c0_30] : memref<1x32xf32, #tpu.memory_space<vmem>>, vector<1x32xf32>
      %56 = vector.broadcast %55 : vector<1x32xf32> to vector<16x32xf32>
      %57 = arith.mulf %54, %56 : vector<16x32xf32>
      %c0_31 = arith.constant 0 : index
      %c0_32 = arith.constant 0 : index
      %58 = vector.load %arg8[%c0_31, %c0_32] : memref<1x32xf32, #tpu.memory_space<vmem>>, vector<1x32xf32>
      %59 = vector.broadcast %58 : vector<1x32xf32> to vector<16x32xf32>
      %60 = arith.addf %57, %59 : vector<16x32xf32>
      %c0_33 = arith.constant 0 : index
      %c0_34 = arith.constant 0 : index
      %61 = vector.load %arg9[%c0_33, %c0_34] : memref<16x32xf32, #tpu.memory_space<vmem>>, vector<16x32xf32>
      tpu.vector_store %arg9[%c0_33, %c0_34], %60 {strides = array<i32>} : memref<16x32xf32, #tpu.memory_space<vmem>>, vector<16x32xf32>,
    } else {
    }
    return
  }
  func.func @transform_0(%arg0: i32, %arg1: i32) -> (i32, i32) {
    %c0_i32 = arith.constant 0 : i32
    %c0_i32_0 = arith.constant 0 : i32
    return %arg0, %c0_i32 : i32, i32
  }
  func.func @transform_1(%arg0: i32, %arg1: i32) -> (i32, i32) {
    %c0_i32 = arith.constant 0 : i32
    %c0_i32_0 = arith.constant 0 : i32
    return %c0_i32, %arg1 : i32, i32
  }
  func.func @transform_2(%arg0: i32, %arg1: i32) -> (i32, i32) {
    %c0_i32 = arith.constant 0 : i32
    %c0_i32_0 = arith.constant 0 : i32
    return %c0_i32, %arg1 : i32, i32
  }
  func.func @transform_3(%arg0: i32, %arg1: i32) -> (i32, i32) {
    %c0_i32 = arith.constant 0 : i32
    %c0_i32_0 = arith.constant 0 : i32
    return %arg1, %c0_i32 : i32, i32
  }
  func.func @transform_4(%arg0: i32, %arg1: i32) -> (i32, i32) {
    %c0_i32 = arith.constant 0 : i32
    %c0_i32_0 = arith.constant 0 : i32
    %c0_i32_1 = arith.constant 0 : i32
    return %c0_i32, %c0_i32_0 : i32, i32
  }
  func.func @transform_5(%arg0: i32, %arg1: i32) -> (i32, i32) {
    %c0_i32 = arith.constant 0 : i32
    %c0_i32_0 = arith.constant 0 : i32
    %c0_i32_1 = arith.constant 0 : i32
    return %c0_i32, %c0_i32_0 : i32, i32
  }
  func.func @transform_6(%arg0: i32, %arg1: i32) -> (i32, i32) {
    %c0_i32 = arith.constant 0 : i32
    %c0_i32_0 = arith.constant 0 : i32
    %c0_i32_1 = arith.constant 0 : i32
    return %c0_i32, %c0_i32_0 : i32, i32
  }
  func.func @transform_7(%arg0: i32, %arg1: i32) -> (i32, i32) {
    %c0_i32 = arith.constant 0 : i32
    %c0_i32_0 = arith.constant 0 : i32
    return %arg0, %c0_i32 : i32, i32
  }
}

module attributes {stable_mosaic.version = 11 : i64} {
  func.func @_attention_kernel(%arg0: i32, %arg1: i32, %arg2: i32, %arg3: i32, %arg4: memref<8x32xf32, #tpu.memory_space<vmem>>, %arg5: memref<8x32xf32, #tpu.memory_space<vmem>>, %arg6: memref<8x32xf32, #tpu.memory_space<vmem>>, %arg7: memref<8x32xf32, #tpu.memory_space<vmem>>, %arg8: memref<4x8x1xf32, #tpu.memory_space<vmem>>, %arg9: memref<4x8x1xf32, #tpu.memory_space<vmem>>, %arg10: memref<8x32xf32, #tpu.memory_space<vmem>>) attributes {dimension_semantics = [#tpu.dimension_semantics<parallel>, #tpu.dimension_semantics<parallel>, #tpu.dimension_semantics<parallel>, #tpu.dimension_semantics<arbitrary>], iteration_bounds = array<i64: 2, 1, 1, 1>, scalar_prefetch = 0 : i64, scratch_operands = 3 : i64, tpu.core_type = #tpu.core_type<tc>, window_params = [{transform_indices = @transform_0, window_bounds = array<i64: 8, 32>}, {transform_indices = @transform_1, window_bounds = array<i64: 8, 32>}, {transform_indices = @transform_2, window_bounds = array<i64: 8, 32>}, {transform_indices = @transform_3, window_bounds = array<i64: 8, 32>}]} {
    %c0_i32 = arith.constant 0 : i32
    %0 = arith.cmpi eq, %arg3, %c0_i32 : i32
    %1 = arith.extui %0 : i1 to i32
    %c0_i32_0 = arith.constant 0 : i32
    %2 = arith.cmpi ne, %1, %c0_i32_0 : i32
    scf.if %2 {
      %cst_99 = arith.constant 0xFF800000 : f32
      %134 = vector.broadcast %cst_99 : f32 to vector<4x8x1xf32>
      %c0_100 = arith.constant 0 : index
      %c0_101 = arith.constant 0 : index
      %c0_102 = arith.constant 0 : index
      %135 = vector.load %arg8[%c0_100, %c0_101, %c0_102] : memref<4x8x1xf32, #tpu.memory_space<vmem>>, vector<4x8x1xf32>
      tpu.vector_store %arg8[%c0_100, %c0_101, %c0_102], %134 {strides = array<i32>} : memref<4x8x1xf32, #tpu.memory_space<vmem>>, vector<4x8x1xf32>,
      %cst_103 = arith.constant 0.000000e+00 : f32
      %136 = vector.broadcast %cst_103 : f32 to vector<4x8x1xf32>
      %c0_104 = arith.constant 0 : index
      %c0_105 = arith.constant 0 : index
      %c0_106 = arith.constant 0 : index
      %137 = vector.load %arg9[%c0_104, %c0_105, %c0_106] : memref<4x8x1xf32, #tpu.memory_space<vmem>>, vector<4x8x1xf32>
      tpu.vector_store %arg9[%c0_104, %c0_105, %c0_106], %136 {strides = array<i32>} : memref<4x8x1xf32, #tpu.memory_space<vmem>>, vector<4x8x1xf32>,
      %cst_107 = arith.constant 0.000000e+00 : f32
      %138 = vector.broadcast %cst_107 : f32 to vector<8x32xf32>
      %c0_108 = arith.constant 0 : index
      %c0_109 = arith.constant 0 : index
      %139 = vector.load %arg10[%c0_108, %c0_109] : memref<8x32xf32, #tpu.memory_space<vmem>>, vector<8x32xf32>
      tpu.vector_store %arg10[%c0_108, %c0_109], %138 {strides = array<i32>} : memref<8x32xf32, #tpu.memory_space<vmem>>, vector<8x32xf32>,
    } else {
    }
    %c0 = arith.constant 0 : index
    %c0_1 = arith.constant 0 : index
    %3 = vector.load %arg4[%c0, %c0_1] : memref<8x32xf32, #tpu.memory_space<vmem>>, vector<8x8xf32>
    %c0_2 = arith.constant 0 : index
    %c0_3 = arith.constant 0 : index
    %4 = vector.load %arg5[%c0_2, %c0_3] : memref<8x32xf32, #tpu.memory_space<vmem>>, vector<8x8xf32>
    %c0_4 = arith.constant 0 : index
    %c0_5 = arith.constant 0 : index
    %5 = vector.load %arg6[%c0_4, %c0_5] : memref<8x32xf32, #tpu.memory_space<vmem>>, vector<8x8xf32>
    %cst = arith.constant dense<0.000000e+00> : vector<8x8xf32>
    %6 = tpu.matmul %3, %4, %cst {dimension_numbers = #tpu.dot_dimension_numbers<[1], [1], [0], [0], [0, 0, 1, 0], [], []>} : vector<8x8xf32>, vector<8x8xf32>, vector<8x8xf32> -> vector<8x8xf32>
    %c0_6 = arith.constant 0 : index
    %c0_7 = arith.constant 0 : index
    %c0_8 = arith.constant 0 : index
    %7 = vector.load %arg8[%c0_6, %c0_7, %c0_8] : memref<4x8x1xf32, #tpu.memory_space<vmem>>, vector<1x8x1xf32>
    %8 = vector.shape_cast %7 : vector<1x8x1xf32> to vector<8x1xf32>
    %c0_9 = arith.constant 0 : index
    %c0_10 = arith.constant 0 : index
    %c0_11 = arith.constant 0 : index
    %9 = vector.load %arg9[%c0_9, %c0_10, %c0_11] : memref<4x8x1xf32, #tpu.memory_space<vmem>>, vector<1x8x1xf32>
    %10 = vector.shape_cast %9 : vector<1x8x1xf32> to vector<8x1xf32>
    %cst_12 = arith.constant dense<0xFF800000> : vector<8xf32>
    %11 = vector.multi_reduction <maximumf>, %6, %cst_12 [1] : vector<8x8xf32> to vector<8xf32>
    %12 = vector.shape_cast %11 : vector<8xf32> to vector<8x1xf32>
    %13 = arith.maximumf %8, %12 : vector<8x1xf32>
    %14 = arith.subf %8, %13 : vector<8x1xf32>
    %15 = math.exp %14 : vector<8x1xf32>
    %16 = vector.broadcast %13 : vector<8x1xf32> to vector<8x8xf32>
    %17 = arith.subf %6, %16 : vector<8x8xf32>
    %18 = math.exp %17 : vector<8x8xf32>
    %19 = arith.mulf %15, %10 : vector<8x1xf32>
    %cst_13 = arith.constant dense<0.000000e+00> : vector<8xf32>
    %20 = vector.multi_reduction <add>, %18, %cst_13 [1] : vector<8x8xf32> to vector<8xf32>
    %21 = vector.shape_cast %20 : vector<8xf32> to vector<8x1xf32>
    %22 = arith.addf %19, %21 : vector<8x1xf32>
    %c0_14 = arith.constant 0 : index
    %c0_15 = arith.constant 0 : index
    %c0_16 = arith.constant 0 : index
    %23 = vector.load %arg9[%c0_14, %c0_15, %c0_16] : memref<4x8x1xf32, #tpu.memory_space<vmem>>, vector<1x8x1xf32>
    %24 = vector.shape_cast %23 : vector<1x8x1xf32> to vector<8x1xf32>
    %25 = vector.shape_cast %22 : vector<8x1xf32> to vector<1x8x1xf32>
    tpu.vector_store %arg9[%c0_14, %c0_15, %c0_16], %25 {strides = array<i32>} : memref<4x8x1xf32, #tpu.memory_space<vmem>>, vector<1x8x1xf32>,
    %c0_17 = arith.constant 0 : index
    %c0_18 = arith.constant 0 : index
    %c0_19 = arith.constant 0 : index
    %26 = vector.load %arg8[%c0_17, %c0_18, %c0_19] : memref<4x8x1xf32, #tpu.memory_space<vmem>>, vector<1x8x1xf32>
    %27 = vector.shape_cast %26 : vector<1x8x1xf32> to vector<8x1xf32>
    %28 = vector.shape_cast %13 : vector<8x1xf32> to vector<1x8x1xf32>
    tpu.vector_store %arg8[%c0_17, %c0_18, %c0_19], %28 {strides = array<i32>} : memref<4x8x1xf32, #tpu.memory_space<vmem>>, vector<1x8x1xf32>,
    %c0_20 = arith.constant 0 : index
    %c0_21 = arith.constant 0 : index
    %29 = vector.load %arg10[%c0_20, %c0_21] : memref<8x32xf32, #tpu.memory_space<vmem>>, vector<8x8xf32>
    %30 = vector.broadcast %15 : vector<8x1xf32> to vector<8x8xf32>
    %31 = arith.mulf %30, %29 : vector<8x8xf32>
    %cst_22 = arith.constant dense<0.000000e+00> : vector<8x8xf32>
    %32 = tpu.matmul %18, %5, %cst_22 {dimension_numbers = #tpu.dot_dimension_numbers<[1], [0], [0], [1], [0, 0, 1, 1], [], []>} : vector<8x8xf32>, vector<8x8xf32>, vector<8x8xf32> -> vector<8x8xf32>
    %33 = arith.addf %31, %32 : vector<8x8xf32>
    %c0_23 = arith.constant 0 : index
    %c0_24 = arith.constant 0 : index
    %34 = vector.load %arg10[%c0_23, %c0_24] : memref<8x32xf32, #tpu.memory_space<vmem>>, vector<8x8xf32>
    tpu.vector_store %arg10[%c0_23, %c0_24], %33 {strides = array<i32>} : memref<8x32xf32, #tpu.memory_space<vmem>>, vector<8x8xf32>,
    %c0_25 = arith.constant 0 : index
    %c8 = arith.constant 8 : index
    %35 = vector.load %arg4[%c0_25, %c8] : memref<8x32xf32, #tpu.memory_space<vmem>>, vector<8x8xf32>
    %c0_26 = arith.constant 0 : index
    %c8_27 = arith.constant 8 : index
    %36 = vector.load %arg5[%c0_26, %c8_27] : memref<8x32xf32, #tpu.memory_space<vmem>>, vector<8x8xf32>
    %c0_28 = arith.constant 0 : index
    %c8_29 = arith.constant 8 : index
    %37 = vector.load %arg6[%c0_28, %c8_29] : memref<8x32xf32, #tpu.memory_space<vmem>>, vector<8x8xf32>
    %cst_30 = arith.constant dense<0.000000e+00> : vector<8x8xf32>
    %38 = tpu.matmul %35, %36, %cst_30 {dimension_numbers = #tpu.dot_dimension_numbers<[1], [1], [0], [0], [0, 0, 1, 0], [], []>} : vector<8x8xf32>, vector<8x8xf32>, vector<8x8xf32> -> vector<8x8xf32>
    %c1 = arith.constant 1 : index
    %c0_31 = arith.constant 0 : index
    %c0_32 = arith.constant 0 : index
    %39 = vector.load %arg8[%c1, %c0_31, %c0_32] : memref<4x8x1xf32, #tpu.memory_space<vmem>>, vector<1x8x1xf32>
    %40 = vector.shape_cast %39 : vector<1x8x1xf32> to vector<8x1xf32>
    %c1_33 = arith.constant 1 : index
    %c0_34 = arith.constant 0 : index
    %c0_35 = arith.constant 0 : index
    %41 = vector.load %arg9[%c1_33, %c0_34, %c0_35] : memref<4x8x1xf32, #tpu.memory_space<vmem>>, vector<1x8x1xf32>
    %42 = vector.shape_cast %41 : vector<1x8x1xf32> to vector<8x1xf32>
    %cst_36 = arith.constant dense<0xFF800000> : vector<8xf32>
    %43 = vector.multi_reduction <maximumf>, %38, %cst_36 [1] : vector<8x8xf32> to vector<8xf32>
    %44 = vector.shape_cast %43 : vector<8xf32> to vector<8x1xf32>
    %45 = arith.maximumf %40, %44 : vector<8x1xf32>
    %46 = arith.subf %40, %45 : vector<8x1xf32>
    %47 = math.exp %46 : vector<8x1xf32>
    %48 = vector.broadcast %45 : vector<8x1xf32> to vector<8x8xf32>
    %49 = arith.subf %38, %48 : vector<8x8xf32>
    %50 = math.exp %49 : vector<8x8xf32>
    %51 = arith.mulf %47, %42 : vector<8x1xf32>
    %cst_37 = arith.constant dense<0.000000e+00> : vector<8xf32>
    %52 = vector.multi_reduction <add>, %50, %cst_37 [1] : vector<8x8xf32> to vector<8xf32>
    %53 = vector.shape_cast %52 : vector<8xf32> to vector<8x1xf32>
    %54 = arith.addf %51, %53 : vector<8x1xf32>
    %c1_38 = arith.constant 1 : index
    %c0_39 = arith.constant 0 : index
    %c0_40 = arith.constant 0 : index
    %55 = vector.load %arg9[%c1_38, %c0_39, %c0_40] : memref<4x8x1xf32, #tpu.memory_space<vmem>>, vector<1x8x1xf32>
    %56 = vector.shape_cast %55 : vector<1x8x1xf32> to vector<8x1xf32>
    %57 = vector.shape_cast %54 : vector<8x1xf32> to vector<1x8x1xf32>
    tpu.vector_store %arg9[%c1_38, %c0_39, %c0_40], %57 {strides = array<i32>} : memref<4x8x1xf32, #tpu.memory_space<vmem>>, vector<1x8x1xf32>,
    %c1_41 = arith.constant 1 : index
    %c0_42 = arith.constant 0 : index
    %c0_43 = arith.constant 0 : index
    %58 = vector.load %arg8[%c1_41, %c0_42, %c0_43] : memref<4x8x1xf32, #tpu.memory_space<vmem>>, vector<1x8x1xf32>
    %59 = vector.shape_cast %58 : vector<1x8x1xf32> to vector<8x1xf32>
    %60 = vector.shape_cast %45 : vector<8x1xf32> to vector<1x8x1xf32>
    tpu.vector_store %arg8[%c1_41, %c0_42, %c0_43], %60 {strides = array<i32>} : memref<4x8x1xf32, #tpu.memory_space<vmem>>, vector<1x8x1xf32>,
    %c0_44 = arith.constant 0 : index
    %c8_45 = arith.constant 8 : index
    %61 = vector.load %arg10[%c0_44, %c8_45] : memref<8x32xf32, #tpu.memory_space<vmem>>, vector<8x8xf32>
    %62 = vector.broadcast %47 : vector<8x1xf32> to vector<8x8xf32>
    %63 = arith.mulf %62, %61 : vector<8x8xf32>
    %cst_46 = arith.constant dense<0.000000e+00> : vector<8x8xf32>
    %64 = tpu.matmul %50, %37, %cst_46 {dimension_numbers = #tpu.dot_dimension_numbers<[1], [0], [0], [1], [0, 0, 1, 1], [], []>} : vector<8x8xf32>, vector<8x8xf32>, vector<8x8xf32> -> vector<8x8xf32>
    %65 = arith.addf %63, %64 : vector<8x8xf32>
    %c0_47 = arith.constant 0 : index
    %c8_48 = arith.constant 8 : index
    %66 = vector.load %arg10[%c0_47, %c8_48] : memref<8x32xf32, #tpu.memory_space<vmem>>, vector<8x8xf32>
    tpu.vector_store %arg10[%c0_47, %c8_48], %65 {strides = array<i32>} : memref<8x32xf32, #tpu.memory_space<vmem>>, vector<8x8xf32>,
    %c0_49 = arith.constant 0 : index
    %c16 = arith.constant 16 : index
    %67 = vector.load %arg4[%c0_49, %c16] : memref<8x32xf32, #tpu.memory_space<vmem>>, vector<8x8xf32>
    %c0_50 = arith.constant 0 : index
    %c16_51 = arith.constant 16 : index
    %68 = vector.load %arg5[%c0_50, %c16_51] : memref<8x32xf32, #tpu.memory_space<vmem>>, vector<8x8xf32>
    %c0_52 = arith.constant 0 : index
    %c16_53 = arith.constant 16 : index
    %69 = vector.load %arg6[%c0_52, %c16_53] : memref<8x32xf32, #tpu.memory_space<vmem>>, vector<8x8xf32>
    %cst_54 = arith.constant dense<0.000000e+00> : vector<8x8xf32>
    %70 = tpu.matmul %67, %68, %cst_54 {dimension_numbers = #tpu.dot_dimension_numbers<[1], [1], [0], [0], [0, 0, 1, 0], [], []>} : vector<8x8xf32>, vector<8x8xf32>, vector<8x8xf32> -> vector<8x8xf32>
    %c2 = arith.constant 2 : index
    %c0_55 = arith.constant 0 : index
    %c0_56 = arith.constant 0 : index
    %71 = vector.load %arg8[%c2, %c0_55, %c0_56] : memref<4x8x1xf32, #tpu.memory_space<vmem>>, vector<1x8x1xf32>
    %72 = vector.shape_cast %71 : vector<1x8x1xf32> to vector<8x1xf32>
    %c2_57 = arith.constant 2 : index
    %c0_58 = arith.constant 0 : index
    %c0_59 = arith.constant 0 : index
    %73 = vector.load %arg9[%c2_57, %c0_58, %c0_59] : memref<4x8x1xf32, #tpu.memory_space<vmem>>, vector<1x8x1xf32>
    %74 = vector.shape_cast %73 : vector<1x8x1xf32> to vector<8x1xf32>
    %cst_60 = arith.constant dense<0xFF800000> : vector<8xf32>
    %75 = vector.multi_reduction <maximumf>, %70, %cst_60 [1] : vector<8x8xf32> to vector<8xf32>
    %76 = vector.shape_cast %75 : vector<8xf32> to vector<8x1xf32>
    %77 = arith.maximumf %72, %76 : vector<8x1xf32>
    %78 = arith.subf %72, %77 : vector<8x1xf32>
    %79 = math.exp %78 : vector<8x1xf32>
    %80 = vector.broadcast %77 : vector<8x1xf32> to vector<8x8xf32>
    %81 = arith.subf %70, %80 : vector<8x8xf32>
    %82 = math.exp %81 : vector<8x8xf32>
    %83 = arith.mulf %79, %74 : vector<8x1xf32>
    %cst_61 = arith.constant dense<0.000000e+00> : vector<8xf32>
    %84 = vector.multi_reduction <add>, %82, %cst_61 [1] : vector<8x8xf32> to vector<8xf32>
    %85 = vector.shape_cast %84 : vector<8xf32> to vector<8x1xf32>
    %86 = arith.addf %83, %85 : vector<8x1xf32>
    %c2_62 = arith.constant 2 : index
    %c0_63 = arith.constant 0 : index
    %c0_64 = arith.constant 0 : index
    %87 = vector.load %arg9[%c2_62, %c0_63, %c0_64] : memref<4x8x1xf32, #tpu.memory_space<vmem>>, vector<1x8x1xf32>
    %88 = vector.shape_cast %87 : vector<1x8x1xf32> to vector<8x1xf32>
    %89 = vector.shape_cast %86 : vector<8x1xf32> to vector<1x8x1xf32>
    tpu.vector_store %arg9[%c2_62, %c0_63, %c0_64], %89 {strides = array<i32>} : memref<4x8x1xf32, #tpu.memory_space<vmem>>, vector<1x8x1xf32>,
    %c2_65 = arith.constant 2 : index
    %c0_66 = arith.constant 0 : index
    %c0_67 = arith.constant 0 : index
    %90 = vector.load %arg8[%c2_65, %c0_66, %c0_67] : memref<4x8x1xf32, #tpu.memory_space<vmem>>, vector<1x8x1xf32>
    %91 = vector.shape_cast %90 : vector<1x8x1xf32> to vector<8x1xf32>
    %92 = vector.shape_cast %77 : vector<8x1xf32> to vector<1x8x1xf32>
    tpu.vector_store %arg8[%c2_65, %c0_66, %c0_67], %92 {strides = array<i32>} : memref<4x8x1xf32, #tpu.memory_space<vmem>>, vector<1x8x1xf32>,
    %c0_68 = arith.constant 0 : index
    %c16_69 = arith.constant 16 : index
    %93 = vector.load %arg10[%c0_68, %c16_69] : memref<8x32xf32, #tpu.memory_space<vmem>>, vector<8x8xf32>
    %94 = vector.broadcast %79 : vector<8x1xf32> to vector<8x8xf32>
    %95 = arith.mulf %94, %93 : vector<8x8xf32>
    %cst_70 = arith.constant dense<0.000000e+00> : vector<8x8xf32>
    %96 = tpu.matmul %82, %69, %cst_70 {dimension_numbers = #tpu.dot_dimension_numbers<[1], [0], [0], [1], [0, 0, 1, 1], [], []>} : vector<8x8xf32>, vector<8x8xf32>, vector<8x8xf32> -> vector<8x8xf32>
    %97 = arith.addf %95, %96 : vector<8x8xf32>
    %c0_71 = arith.constant 0 : index
    %c16_72 = arith.constant 16 : index
    %98 = vector.load %arg10[%c0_71, %c16_72] : memref<8x32xf32, #tpu.memory_space<vmem>>, vector<8x8xf32>
    tpu.vector_store %arg10[%c0_71, %c16_72], %97 {strides = array<i32>} : memref<8x32xf32, #tpu.memory_space<vmem>>, vector<8x8xf32>,
    %c0_73 = arith.constant 0 : index
    %c24 = arith.constant 24 : index
    %99 = vector.load %arg4[%c0_73, %c24] : memref<8x32xf32, #tpu.memory_space<vmem>>, vector<8x8xf32>
    %c0_74 = arith.constant 0 : index
    %c24_75 = arith.constant 24 : index
    %100 = vector.load %arg5[%c0_74, %c24_75] : memref<8x32xf32, #tpu.memory_space<vmem>>, vector<8x8xf32>
    %c0_76 = arith.constant 0 : index
    %c24_77 = arith.constant 24 : index
    %101 = vector.load %arg6[%c0_76, %c24_77] : memref<8x32xf32, #tpu.memory_space<vmem>>, vector<8x8xf32>
    %cst_78 = arith.constant dense<0.000000e+00> : vector<8x8xf32>
    %102 = tpu.matmul %99, %100, %cst_78 {dimension_numbers = #tpu.dot_dimension_numbers<[1], [1], [0], [0], [0, 0, 1, 0], [], []>} : vector<8x8xf32>, vector<8x8xf32>, vector<8x8xf32> -> vector<8x8xf32>
    %c3 = arith.constant 3 : index
    %c0_79 = arith.constant 0 : index
    %c0_80 = arith.constant 0 : index
    %103 = vector.load %arg8[%c3, %c0_79, %c0_80] : memref<4x8x1xf32, #tpu.memory_space<vmem>>, vector<1x8x1xf32>
    %104 = vector.shape_cast %103 : vector<1x8x1xf32> to vector<8x1xf32>
    %c3_81 = arith.constant 3 : index
    %c0_82 = arith.constant 0 : index
    %c0_83 = arith.constant 0 : index
    %105 = vector.load %arg9[%c3_81, %c0_82, %c0_83] : memref<4x8x1xf32, #tpu.memory_space<vmem>>, vector<1x8x1xf32>
    %106 = vector.shape_cast %105 : vector<1x8x1xf32> to vector<8x1xf32>
    %cst_84 = arith.constant dense<0xFF800000> : vector<8xf32>
    %107 = vector.multi_reduction <maximumf>, %102, %cst_84 [1] : vector<8x8xf32> to vector<8xf32>
    %108 = vector.shape_cast %107 : vector<8xf32> to vector<8x1xf32>
    %109 = arith.maximumf %104, %108 : vector<8x1xf32>
    %110 = arith.subf %104, %109 : vector<8x1xf32>
    %111 = math.exp %110 : vector<8x1xf32>
    %112 = vector.broadcast %109 : vector<8x1xf32> to vector<8x8xf32>
    %113 = arith.subf %102, %112 : vector<8x8xf32>
    %114 = math.exp %113 : vector<8x8xf32>
    %115 = arith.mulf %111, %106 : vector<8x1xf32>
    %cst_85 = arith.constant dense<0.000000e+00> : vector<8xf32>
    %116 = vector.multi_reduction <add>, %114, %cst_85 [1] : vector<8x8xf32> to vector<8xf32>
    %117 = vector.shape_cast %116 : vector<8xf32> to vector<8x1xf32>
    %118 = arith.addf %115, %117 : vector<8x1xf32>
    %c3_86 = arith.constant 3 : index
    %c0_87 = arith.constant 0 : index
    %c0_88 = arith.constant 0 : index
    %119 = vector.load %arg9[%c3_86, %c0_87, %c0_88] : memref<4x8x1xf32, #tpu.memory_space<vmem>>, vector<1x8x1xf32>
    %120 = vector.shape_cast %119 : vector<1x8x1xf32> to vector<8x1xf32>
    %121 = vector.shape_cast %118 : vector<8x1xf32> to vector<1x8x1xf32>
    tpu.vector_store %arg9[%c3_86, %c0_87, %c0_88], %121 {strides = array<i32>} : memref<4x8x1xf32, #tpu.memory_space<vmem>>, vector<1x8x1xf32>,
    %c3_89 = arith.constant 3 : index
    %c0_90 = arith.constant 0 : index
    %c0_91 = arith.constant 0 : index
    %122 = vector.load %arg8[%c3_89, %c0_90, %c0_91] : memref<4x8x1xf32, #tpu.memory_space<vmem>>, vector<1x8x1xf32>
    %123 = vector.shape_cast %122 : vector<1x8x1xf32> to vector<8x1xf32>
    %124 = vector.shape_cast %109 : vector<8x1xf32> to vector<1x8x1xf32>
    tpu.vector_store %arg8[%c3_89, %c0_90, %c0_91], %124 {strides = array<i32>} : memref<4x8x1xf32, #tpu.memory_space<vmem>>, vector<1x8x1xf32>,
    %c0_92 = arith.constant 0 : index
    %c24_93 = arith.constant 24 : index
    %125 = vector.load %arg10[%c0_92, %c24_93] : memref<8x32xf32, #tpu.memory_space<vmem>>, vector<8x8xf32>
    %126 = vector.broadcast %111 : vector<8x1xf32> to vector<8x8xf32>
    %127 = arith.mulf %126, %125 : vector<8x8xf32>
    %cst_94 = arith.constant dense<0.000000e+00> : vector<8x8xf32>
    %128 = tpu.matmul %114, %101, %cst_94 {dimension_numbers = #tpu.dot_dimension_numbers<[1], [0], [0], [1], [0, 0, 1, 1], [], []>} : vector<8x8xf32>, vector<8x8xf32>, vector<8x8xf32> -> vector<8x8xf32>
    %129 = arith.addf %127, %128 : vector<8x8xf32>
    %c0_95 = arith.constant 0 : index
    %c24_96 = arith.constant 24 : index
    %130 = vector.load %arg10[%c0_95, %c24_96] : memref<8x32xf32, #tpu.memory_space<vmem>>, vector<8x8xf32>
    tpu.vector_store %arg10[%c0_95, %c24_96], %129 {strides = array<i32>} : memref<8x32xf32, #tpu.memory_space<vmem>>, vector<8x8xf32>,
    %c0_i32_97 = arith.constant 0 : i32
    %131 = arith.cmpi eq, %arg3, %c0_i32_97 : i32
    %132 = arith.extui %131 : i1 to i32
    %c0_i32_98 = arith.constant 0 : i32
    %133 = arith.cmpi ne, %132, %c0_i32_98 : i32
    scf.if %133 {
      %c0_99 = arith.constant 0 : index
      %c0_100 = arith.constant 0 : index
      %c0_101 = arith.constant 0 : index
      %134 = vector.load %arg9[%c0_99, %c0_100, %c0_101] : memref<4x8x1xf32, #tpu.memory_space<vmem>>, vector<1x8x1xf32>
      %135 = vector.shape_cast %134 : vector<1x8x1xf32> to vector<8x1xf32>
      %136 = tpu.reciprocal %135 : vector<8x1xf32> -> vector<8x1xf32>
      %c0_102 = arith.constant 0 : index
      %c0_103 = arith.constant 0 : index
      %137 = vector.load %arg10[%c0_102, %c0_103] : memref<8x32xf32, #tpu.memory_space<vmem>>, vector<8x8xf32>
      %138 = vector.broadcast %136 : vector<8x1xf32> to vector<8x8xf32>
      %139 = arith.mulf %137, %138 : vector<8x8xf32>
      %c1_104 = arith.constant 1 : index
      %c0_105 = arith.constant 0 : index
      %c0_106 = arith.constant 0 : index
      %140 = vector.load %arg9[%c1_104, %c0_105, %c0_106] : memref<4x8x1xf32, #tpu.memory_space<vmem>>, vector<1x8x1xf32>
      %141 = vector.shape_cast %140 : vector<1x8x1xf32> to vector<8x1xf32>
      %142 = tpu.reciprocal %141 : vector<8x1xf32> -> vector<8x1xf32>
      %c0_107 = arith.constant 0 : index
      %c8_108 = arith.constant 8 : index
      %143 = vector.load %arg10[%c0_107, %c8_108] : memref<8x32xf32, #tpu.memory_space<vmem>>, vector<8x8xf32>
      %144 = vector.broadcast %142 : vector<8x1xf32> to vector<8x8xf32>
      %145 = arith.mulf %143, %144 : vector<8x8xf32>
      %c2_109 = arith.constant 2 : index
      %c0_110 = arith.constant 0 : index
      %c0_111 = arith.constant 0 : index
      %146 = vector.load %arg9[%c2_109, %c0_110, %c0_111] : memref<4x8x1xf32, #tpu.memory_space<vmem>>, vector<1x8x1xf32>
      %147 = vector.shape_cast %146 : vector<1x8x1xf32> to vector<8x1xf32>
      %148 = tpu.reciprocal %147 : vector<8x1xf32> -> vector<8x1xf32>
      %c0_112 = arith.constant 0 : index
      %c16_113 = arith.constant 16 : index
      %149 = vector.load %arg10[%c0_112, %c16_113] : memref<8x32xf32, #tpu.memory_space<vmem>>, vector<8x8xf32>
      %150 = vector.broadcast %148 : vector<8x1xf32> to vector<8x8xf32>
      %151 = arith.mulf %149, %150 : vector<8x8xf32>
      %c3_114 = arith.constant 3 : index
      %c0_115 = arith.constant 0 : index
      %c0_116 = arith.constant 0 : index
      %152 = vector.load %arg9[%c3_114, %c0_115, %c0_116] : memref<4x8x1xf32, #tpu.memory_space<vmem>>, vector<1x8x1xf32>
      %153 = vector.shape_cast %152 : vector<1x8x1xf32> to vector<8x1xf32>
      %154 = tpu.reciprocal %153 : vector<8x1xf32> -> vector<8x1xf32>
      %c0_117 = arith.constant 0 : index
      %c24_118 = arith.constant 24 : index
      %155 = vector.load %arg10[%c0_117, %c24_118] : memref<8x32xf32, #tpu.memory_space<vmem>>, vector<8x8xf32>
      %156 = vector.broadcast %154 : vector<8x1xf32> to vector<8x8xf32>
      %157 = arith.mulf %155, %156 : vector<8x8xf32>
      %158 = tpu.concatenate %139, %145, %151, %157 in 1 : vector<8x8xf32>, vector<8x8xf32>, vector<8x8xf32>, vector<8x8xf32> -> vector<8x32xf32>
      %c0_119 = arith.constant 0 : index
      %c0_120 = arith.constant 0 : index
      %159 = vector.load %arg7[%c0_119, %c0_120] : memref<8x32xf32, #tpu.memory_space<vmem>>, vector<8x32xf32>
      tpu.vector_store %arg7[%c0_119, %c0_120], %158 {strides = array<i32>} : memref<8x32xf32, #tpu.memory_space<vmem>>, vector<8x32xf32>,
    } else {
    }
    return
  }
  func.func @transform_0(%arg0: i32, %arg1: i32, %arg2: i32, %arg3: i32) -> (i32, i32) {
    %c1_i32 = arith.constant 1 : i32
    %0 = arith.muli %arg0, %c1_i32 : i32
    %1 = arith.addi %0, %arg2 : i32
    %c0_i32 = arith.constant 0 : i32
    return %1, %arg1 : i32, i32
  }
  func.func @transform_1(%arg0: i32, %arg1: i32, %arg2: i32, %arg3: i32) -> (i32, i32) {
    %c1_i32 = arith.constant 1 : i32
    %0 = arith.muli %arg0, %c1_i32 : i32
    %1 = arith.addi %0, %arg3 : i32
    %c0_i32 = arith.constant 0 : i32
    return %1, %arg1 : i32, i32
  }
  func.func @transform_2(%arg0: i32, %arg1: i32, %arg2: i32, %arg3: i32) -> (i32, i32) {
    %c1_i32 = arith.constant 1 : i32
    %0 = arith.muli %arg0, %c1_i32 : i32
    %1 = arith.addi %0, %arg3 : i32
    %c0_i32 = arith.constant 0 : i32
    return %1, %arg1 : i32, i32
  }
  func.func @transform_3(%arg0: i32, %arg1: i32, %arg2: i32, %arg3: i32) -> (i32, i32) {
    %c1_i32 = arith.constant 1 : i32
    %0 = arith.muli %arg0, %c1_i32 : i32
    %1 = arith.addi %0, %arg2 : i32
    %c0_i32 = arith.constant 0 : i32
    return %1, %arg1 : i32, i32
  }
}

module attributes {stable_mosaic.version = 11 : i64} {
  func.func @_qkv_kernel(%arg0: i32, %arg1: memref<16x32xf32, #tpu.memory_space<vmem>>, %arg2: memref<32x32xf32, #tpu.memory_space<vmem>>, %arg3: memref<32x32xf32, #tpu.memory_space<vmem>>, %arg4: memref<32x32xf32, #tpu.memory_space<vmem>>, %arg5: memref<1x32xf32, #tpu.memory_space<vmem>>, %arg6: memref<1x32xf32, #tpu.memory_space<vmem>>, %arg7: memref<1x32xf32, #tpu.memory_space<vmem>>, %arg8: memref<16x32xf32, #tpu.memory_space<vmem>>, %arg9: memref<16x32xf32, #tpu.memory_space<vmem>>, %arg10: memref<16x32xf32, #tpu.memory_space<vmem>>) attributes {dimension_semantics = [#tpu.dimension_semantics<parallel>], iteration_bounds = array<i64: 1>, scalar_prefetch = 0 : i64, scratch_operands = 0 : i64, tpu.core_type = #tpu.core_type<tc>, window_params = [{transform_indices = @transform_0, window_bounds = array<i64: 16, 32>}, {pipeline_mode = #tpu.pipeline_mode<synchronous>, transform_indices = @transform_1, window_bounds = array<i64: 32, 32>}, {pipeline_mode = #tpu.pipeline_mode<synchronous>, transform_indices = @transform_2, window_bounds = array<i64: 32, 32>}, {pipeline_mode = #tpu.pipeline_mode<synchronous>, transform_indices = @transform_3, window_bounds = array<i64: 32, 32>}, {pipeline_mode = #tpu.pipeline_mode<synchronous>, transform_indices = @transform_4, window_bounds = array<i64: 1, 32>}, {pipeline_mode = #tpu.pipeline_mode<synchronous>, transform_indices = @transform_5, window_bounds = array<i64: 1, 32>}, {pipeline_mode = #tpu.pipeline_mode<synchronous>, transform_indices = @transform_6, window_bounds = array<i64: 1, 32>}, {transform_indices = @transform_7, window_bounds = array<i64: 16, 32>}, {transform_indices = @transform_8, window_bounds = array<i64: 16, 32>}, {transform_indices = @transform_9, window_bounds = array<i64: 16, 32>}]} {
    %c0 = arith.constant 0 : index
    %c0_0 = arith.constant 0 : index
    %0 = vector.load %arg1[%c0, %c0_0] : memref<16x32xf32, #tpu.memory_space<vmem>>, vector<16x32xf32>
    %c0_1 = arith.constant 0 : index
    %c0_2 = arith.constant 0 : index
    %1 = vector.load %arg2[%c0_1, %c0_2] : memref<32x32xf32, #tpu.memory_space<vmem>>, vector<32x32xf32>
    %cst = arith.constant dense<0.000000e+00> : vector<16x32xf32>
    %2 = tpu.matmul %0, %1, %cst {dimension_numbers = #tpu.dot_dimension_numbers<[1], [0], [0], [1], [0, 0, 1, 1], [], []>} : vector<16x32xf32>, vector<32x32xf32>, vector<16x32xf32> -> vector<16x32xf32>
    %c0_3 = arith.constant 0 : index
    %c0_4 = arith.constant 0 : index
    %3 = vector.load %arg5[%c0_3, %c0_4] : memref<1x32xf32, #tpu.memory_space<vmem>>, vector<1x32xf32>
    %4 = vector.broadcast %3 : vector<1x32xf32> to vector<16x32xf32>
    %5 = arith.addf %2, %4 : vector<16x32xf32>
    %c0_5 = arith.constant 0 : index
    %c0_6 = arith.constant 0 : index
    %6 = vector.load %arg8[%c0_5, %c0_6] : memref<16x32xf32, #tpu.memory_space<vmem>>, vector<16x32xf32>
    tpu.vector_store %arg8[%c0_5, %c0_6], %5 {strides = array<i32>} : memref<16x32xf32, #tpu.memory_space<vmem>>, vector<16x32xf32>,
    %c0_7 = arith.constant 0 : index
    %c0_8 = arith.constant 0 : index
    %7 = vector.load %arg3[%c0_7, %c0_8] : memref<32x32xf32, #tpu.memory_space<vmem>>, vector<32x32xf32>
    %cst_9 = arith.constant dense<0.000000e+00> : vector<16x32xf32>
    %8 = tpu.matmul %0, %7, %cst_9 {dimension_numbers = #tpu.dot_dimension_numbers<[1], [0], [0], [1], [0, 0, 1, 1], [], []>} : vector<16x32xf32>, vector<32x32xf32>, vector<16x32xf32> -> vector<16x32xf32>
    %c0_10 = arith.constant 0 : index
    %c0_11 = arith.constant 0 : index
    %9 = vector.load %arg6[%c0_10, %c0_11] : memref<1x32xf32, #tpu.memory_space<vmem>>, vector<1x32xf32>
    %10 = vector.broadcast %9 : vector<1x32xf32> to vector<16x32xf32>
    %11 = arith.addf %8, %10 : vector<16x32xf32>
    %c0_12 = arith.constant 0 : index
    %c0_13 = arith.constant 0 : index
    %12 = vector.load %arg9[%c0_12, %c0_13] : memref<16x32xf32, #tpu.memory_space<vmem>>, vector<16x32xf32>
    tpu.vector_store %arg9[%c0_12, %c0_13], %11 {strides = array<i32>} : memref<16x32xf32, #tpu.memory_space<vmem>>, vector<16x32xf32>,
    %c0_14 = arith.constant 0 : index
    %c0_15 = arith.constant 0 : index
    %13 = vector.load %arg4[%c0_14, %c0_15] : memref<32x32xf32, #tpu.memory_space<vmem>>, vector<32x32xf32>
    %cst_16 = arith.constant dense<0.000000e+00> : vector<16x32xf32>
    %14 = tpu.matmul %0, %13, %cst_16 {dimension_numbers = #tpu.dot_dimension_numbers<[1], [0], [0], [1], [0, 0, 1, 1], [], []>} : vector<16x32xf32>, vector<32x32xf32>, vector<16x32xf32> -> vector<16x32xf32>
    %c0_17 = arith.constant 0 : index
    %c0_18 = arith.constant 0 : index
    %15 = vector.load %arg7[%c0_17, %c0_18] : memref<1x32xf32, #tpu.memory_space<vmem>>, vector<1x32xf32>
    %16 = vector.broadcast %15 : vector<1x32xf32> to vector<16x32xf32>
    %17 = arith.addf %14, %16 : vector<16x32xf32>
    %c0_19 = arith.constant 0 : index
    %c0_20 = arith.constant 0 : index
    %18 = vector.load %arg10[%c0_19, %c0_20] : memref<16x32xf32, #tpu.memory_space<vmem>>, vector<16x32xf32>
    tpu.vector_store %arg10[%c0_19, %c0_20], %17 {strides = array<i32>} : memref<16x32xf32, #tpu.memory_space<vmem>>, vector<16x32xf32>,
    return
  }
  func.func @transform_0(%arg0: i32) -> (i32, i32) {
    %c0_i32 = arith.constant 0 : i32
    %c0_i32_0 = arith.constant 0 : i32
    return %arg0, %c0_i32 : i32, i32
  }
  func.func @transform_1(%arg0: i32) -> (i32, i32) {
    %c0_i32 = arith.constant 0 : i32
    %c0_i32_0 = arith.constant 0 : i32
    %c0_i32_1 = arith.constant 0 : i32
    return %c0_i32, %c0_i32_0 : i32, i32
  }
  func.func @transform_2(%arg0: i32) -> (i32, i32) {
    %c0_i32 = arith.constant 0 : i32
    %c0_i32_0 = arith.constant 0 : i32
    %c0_i32_1 = arith.constant 0 : i32
    return %c0_i32, %c0_i32_0 : i32, i32
  }
  func.func @transform_3(%arg0: i32) -> (i32, i32) {
    %c0_i32 = arith.constant 0 : i32
    %c0_i32_0 = arith.constant 0 : i32
    %c0_i32_1 = arith.constant 0 : i32
    return %c0_i32, %c0_i32_0 : i32, i32
  }
  func.func @transform_4(%arg0: i32) -> (i32, i32) {
    %c0_i32 = arith.constant 0 : i32
    %c0_i32_0 = arith.constant 0 : i32
    %c0_i32_1 = arith.constant 0 : i32
    return %c0_i32, %c0_i32_0 : i32, i32
  }
  func.func @transform_5(%arg0: i32) -> (i32, i32) {
    %c0_i32 = arith.constant 0 : i32
    %c0_i32_0 = arith.constant 0 : i32
    %c0_i32_1 = arith.constant 0 : i32
    return %c0_i32, %c0_i32_0 : i32, i32
  }
  func.func @transform_6(%arg0: i32) -> (i32, i32) {
    %c0_i32 = arith.constant 0 : i32
    %c0_i32_0 = arith.constant 0 : i32
    %c0_i32_1 = arith.constant 0 : i32
    return %c0_i32, %c0_i32_0 : i32, i32
  }
  func.func @transform_7(%arg0: i32) -> (i32, i32) {
    %c0_i32 = arith.constant 0 : i32
    %c0_i32_0 = arith.constant 0 : i32
    return %arg0, %c0_i32 : i32, i32
  }
  func.func @transform_8(%arg0: i32) -> (i32, i32) {
    %c0_i32 = arith.constant 0 : i32
    %c0_i32_0 = arith.constant 0 : i32
    return %arg0, %c0_i32 : i32, i32
  }
  func.func @transform_9(%arg0: i32) -> (i32, i32) {
    %c0_i32 = arith.constant 0 : i32
    %c0_i32_0 = arith.constant 0 : i32
    return %arg0, %c0_i32 : i32, i32
  }
}

module attributes {stable_mosaic.version = 11 : i64} {
  func.func @_qkv_kernel(%arg0: i32, %arg1: memref<16x32xf32, #tpu.memory_space<vmem>>, %arg2: memref<32x32xf32, #tpu.memory_space<vmem>>, %arg3: memref<32x32xf32, #tpu.memory_space<vmem>>, %arg4: memref<32x32xf32, #tpu.memory_space<vmem>>, %arg5: memref<1x32xf32, #tpu.memory_space<vmem>>, %arg6: memref<1x32xf32, #tpu.memory_space<vmem>>, %arg7: memref<1x32xf32, #tpu.memory_space<vmem>>, %arg8: memref<16x32xf32, #tpu.memory_space<vmem>>, %arg9: memref<16x32xf32, #tpu.memory_space<vmem>>, %arg10: memref<16x32xf32, #tpu.memory_space<vmem>>) attributes {dimension_semantics = [#tpu.dimension_semantics<parallel>], iteration_bounds = array<i64: 1>, scalar_prefetch = 0 : i64, scratch_operands = 0 : i64, tpu.core_type = #tpu.core_type<tc>, window_params = [{transform_indices = @transform_0, window_bounds = array<i64: 16, 32>}, {pipeline_mode = #tpu.pipeline_mode<synchronous>, transform_indices = @transform_1, window_bounds = array<i64: 32, 32>}, {pipeline_mode = #tpu.pipeline_mode<synchronous>, transform_indices = @transform_2, window_bounds = array<i64: 32, 32>}, {pipeline_mode = #tpu.pipeline_mode<synchronous>, transform_indices = @transform_3, window_bounds = array<i64: 32, 32>}, {pipeline_mode = #tpu.pipeline_mode<synchronous>, transform_indices = @transform_4, window_bounds = array<i64: 1, 32>}, {pipeline_mode = #tpu.pipeline_mode<synchronous>, transform_indices = @transform_5, window_bounds = array<i64: 1, 32>}, {pipeline_mode = #tpu.pipeline_mode<synchronous>, transform_indices = @transform_6, window_bounds = array<i64: 1, 32>}, {transform_indices = @transform_7, window_bounds = array<i64: 16, 32>}, {transform_indices = @transform_8, window_bounds = array<i64: 16, 32>}, {transform_indices = @transform_9, window_bounds = array<i64: 16, 32>}]} {
    %c0 = arith.constant 0 : index
    %c0_0 = arith.constant 0 : index
    %0 = vector.load %arg1[%c0, %c0_0] : memref<16x32xf32, #tpu.memory_space<vmem>>, vector<16x32xf32>
    %c0_1 = arith.constant 0 : index
    %c0_2 = arith.constant 0 : index
    %1 = vector.load %arg2[%c0_1, %c0_2] : memref<32x32xf32, #tpu.memory_space<vmem>>, vector<32x32xf32>
    %cst = arith.constant dense<0.000000e+00> : vector<16x32xf32>
    %2 = tpu.matmul %0, %1, %cst {dimension_numbers = #tpu.dot_dimension_numbers<[1], [0], [0], [1], [0, 0, 1, 1], [], []>} : vector<16x32xf32>, vector<32x32xf32>, vector<16x32xf32> -> vector<16x32xf32>
    %c0_3 = arith.constant 0 : index
    %c0_4 = arith.constant 0 : index
    %3 = vector.load %arg5[%c0_3, %c0_4] : memref<1x32xf32, #tpu.memory_space<vmem>>, vector<1x32xf32>
    %4 = vector.broadcast %3 : vector<1x32xf32> to vector<16x32xf32>
    %5 = arith.addf %2, %4 : vector<16x32xf32>
    %c0_5 = arith.constant 0 : index
    %c0_6 = arith.constant 0 : index
    %6 = vector.load %arg8[%c0_5, %c0_6] : memref<16x32xf32, #tpu.memory_space<vmem>>, vector<16x32xf32>
    tpu.vector_store %arg8[%c0_5, %c0_6], %5 {strides = array<i32>} : memref<16x32xf32, #tpu.memory_space<vmem>>, vector<16x32xf32>,
    %c0_7 = arith.constant 0 : index
    %c0_8 = arith.constant 0 : index
    %7 = vector.load %arg3[%c0_7, %c0_8] : memref<32x32xf32, #tpu.memory_space<vmem>>, vector<32x32xf32>
    %cst_9 = arith.constant dense<0.000000e+00> : vector<16x32xf32>
    %8 = tpu.matmul %0, %7, %cst_9 {dimension_numbers = #tpu.dot_dimension_numbers<[1], [0], [0], [1], [0, 0, 1, 1], [], []>} : vector<16x32xf32>, vector<32x32xf32>, vector<16x32xf32> -> vector<16x32xf32>
    %c0_10 = arith.constant 0 : index
    %c0_11 = arith.constant 0 : index
    %9 = vector.load %arg6[%c0_10, %c0_11] : memref<1x32xf32, #tpu.memory_space<vmem>>, vector<1x32xf32>
    %10 = vector.broadcast %9 : vector<1x32xf32> to vector<16x32xf32>
    %11 = arith.addf %8, %10 : vector<16x32xf32>
    %c0_12 = arith.constant 0 : index
    %c0_13 = arith.constant 0 : index
    %12 = vector.load %arg9[%c0_12, %c0_13] : memref<16x32xf32, #tpu.memory_space<vmem>>, vector<16x32xf32>
    tpu.vector_store %arg9[%c0_12, %c0_13], %11 {strides = array<i32>} : memref<16x32xf32, #tpu.memory_space<vmem>>, vector<16x32xf32>,
    %c0_14 = arith.constant 0 : index
    %c0_15 = arith.constant 0 : index
    %13 = vector.load %arg4[%c0_14, %c0_15] : memref<32x32xf32, #tpu.memory_space<vmem>>, vector<32x32xf32>
    %cst_16 = arith.constant dense<0.000000e+00> : vector<16x32xf32>
    %14 = tpu.matmul %0, %13, %cst_16 {dimension_numbers = #tpu.dot_dimension_numbers<[1], [0], [0], [1], [0, 0, 1, 1], [], []>} : vector<16x32xf32>, vector<32x32xf32>, vector<16x32xf32> -> vector<16x32xf32>
    %c0_17 = arith.constant 0 : index
    %c0_18 = arith.constant 0 : index
    %15 = vector.load %arg7[%c0_17, %c0_18] : memref<1x32xf32, #tpu.memory_space<vmem>>, vector<1x32xf32>
    %16 = vector.broadcast %15 : vector<1x32xf32> to vector<16x32xf32>
    %17 = arith.addf %14, %16 : vector<16x32xf32>
    %c0_19 = arith.constant 0 : index
    %c0_20 = arith.constant 0 : index
    %18 = vector.load %arg10[%c0_19, %c0_20] : memref<16x32xf32, #tpu.memory_space<vmem>>, vector<16x32xf32>
    tpu.vector_store %arg10[%c0_19, %c0_20], %17 {strides = array<i32>} : memref<16x32xf32, #tpu.memory_space<vmem>>, vector<16x32xf32>,
    return
  }
  func.func @transform_0(%arg0: i32) -> (i32, i32) {
    %c0_i32 = arith.constant 0 : i32
    %c0_i32_0 = arith.constant 0 : i32
    return %arg0, %c0_i32 : i32, i32
  }
  func.func @transform_1(%arg0: i32) -> (i32, i32) {
    %c0_i32 = arith.constant 0 : i32
    %c0_i32_0 = arith.constant 0 : i32
    %c0_i32_1 = arith.constant 0 : i32
    return %c0_i32, %c0_i32_0 : i32, i32
  }
  func.func @transform_2(%arg0: i32) -> (i32, i32) {
    %c0_i32 = arith.constant 0 : i32
    %c0_i32_0 = arith.constant 0 : i32
    %c0_i32_1 = arith.constant 0 : i32
    return %c0_i32, %c0_i32_0 : i32, i32
  }
  func.func @transform_3(%arg0: i32) -> (i32, i32) {
    %c0_i32 = arith.constant 0 : i32
    %c0_i32_0 = arith.constant 0 : i32
    %c0_i32_1 = arith.constant 0 : i32
    return %c0_i32, %c0_i32_0 : i32, i32
  }
  func.func @transform_4(%arg0: i32) -> (i32, i32) {
    %c0_i32 = arith.constant 0 : i32
    %c0_i32_0 = arith.constant 0 : i32
    %c0_i32_1 = arith.constant 0 : i32
    return %c0_i32, %c0_i32_0 : i32, i32
  }
  func.func @transform_5(%arg0: i32) -> (i32, i32) {
    %c0_i32 = arith.constant 0 : i32
    %c0_i32_0 = arith.constant 0 : i32
    %c0_i32_1 = arith.constant 0 : i32
    return %c0_i32, %c0_i32_0 : i32, i32
  }
  func.func @transform_6(%arg0: i32) -> (i32, i32) {
    %c0_i32 = arith.constant 0 : i32
    %c0_i32_0 = arith.constant 0 : i32
    %c0_i32_1 = arith.constant 0 : i32
    return %c0_i32, %c0_i32_0 : i32, i32
  }
  func.func @transform_7(%arg0: i32) -> (i32, i32) {
    %c0_i32 = arith.constant 0 : i32
    %c0_i32_0 = arith.constant 0 : i32
    return %arg0, %c0_i32 : i32, i32
  }
  func.func @transform_8(%arg0: i32) -> (i32, i32) {
    %c0_i32 = arith.constant 0 : i32
    %c0_i32_0 = arith.constant 0 : i32
    return %arg0, %c0_i32 : i32, i32
  }
  func.func @transform_9(%arg0: i32) -> (i32, i32) {
    %c0_i32 = arith.constant 0 : i32
    %c0_i32_0 = arith.constant 0 : i32
    return %arg0, %c0_i32 : i32, i32
  }
}

module attributes {stable_mosaic.version = 11 : i64} {
  func.func @_ffn_ln_kernel(%arg0: i32, %arg1: i32, %arg2: memref<16x32xf32, #tpu.memory_space<vmem>>, %arg3: memref<32x64xf32, #tpu.memory_space<vmem>>, %arg4: memref<1x64xf32, #tpu.memory_space<vmem>>, %arg5: memref<64x32xf32, #tpu.memory_space<vmem>>, %arg6: memref<1x32xf32, #tpu.memory_space<vmem>>, %arg7: memref<1x32xf32, #tpu.memory_space<vmem>>, %arg8: memref<1x32xf32, #tpu.memory_space<vmem>>, %arg9: memref<16x32xf32, #tpu.memory_space<vmem>>, %arg10: memref<16x32xf32, #tpu.memory_space<vmem>>) attributes {dimension_semantics = [#tpu.dimension_semantics<parallel>, #tpu.dimension_semantics<arbitrary>], iteration_bounds = array<i64: 1, 1>, scalar_prefetch = 0 : i64, scratch_operands = 1 : i64, tpu.core_type = #tpu.core_type<tc>, window_params = [{transform_indices = @transform_0, window_bounds = array<i64: 16, 32>}, {transform_indices = @transform_1, window_bounds = array<i64: 32, 64>}, {transform_indices = @transform_2, window_bounds = array<i64: 1, 64>}, {transform_indices = @transform_3, window_bounds = array<i64: 64, 32>}, {pipeline_mode = #tpu.pipeline_mode<synchronous>, transform_indices = @transform_4, window_bounds = array<i64: 1, 32>}, {pipeline_mode = #tpu.pipeline_mode<synchronous>, transform_indices = @transform_5, window_bounds = array<i64: 1, 32>}, {pipeline_mode = #tpu.pipeline_mode<synchronous>, transform_indices = @transform_6, window_bounds = array<i64: 1, 32>}, {transform_indices = @transform_7, window_bounds = array<i64: 16, 32>}]} {
    %c0_i32 = arith.constant 0 : i32
    %0 = arith.cmpi eq, %arg1, %c0_i32 : i32
    %1 = arith.extui %0 : i1 to i32
    %c0_i32_0 = arith.constant 0 : i32
    %2 = arith.cmpi ne, %1, %c0_i32_0 : i32
    scf.if %2 {
      %cst_20 = arith.constant 0.000000e+00 : f32
      %32 = vector.broadcast %cst_20 : f32 to vector<16x32xf32>
      %c0_21 = arith.constant 0 : index
      %c0_22 = arith.constant 0 : index
      %33 = vector.load %arg10[%c0_21, %c0_22] : memref<16x32xf32, #tpu.memory_space<vmem>>, vector<16x32xf32>
      tpu.vector_store %arg10[%c0_21, %c0_22], %32 {strides = array<i32>} : memref<16x32xf32, #tpu.memory_space<vmem>>, vector<16x32xf32>,
    } else {
    }
    %c0 = arith.constant 0 : index
    %c0_1 = arith.constant 0 : index
    %3 = vector.load %arg2[%c0, %c0_1] : memref<16x32xf32, #tpu.memory_space<vmem>>, vector<16x32xf32>
    %cst = arith.constant 2.000000e+00 : f32
    %4 = vector.broadcast %cst : f32 to vector<16x32xf32>
    %5 = arith.mulf %3, %4 : vector<16x32xf32>
    %c0_2 = arith.constant 0 : index
    %c0_3 = arith.constant 0 : index
    %6 = vector.load %arg3[%c0_2, %c0_3] : memref<32x64xf32, #tpu.memory_space<vmem>>, vector<32x64xf32>
    %cst_4 = arith.constant dense<0.000000e+00> : vector<16x64xf32>
    %7 = tpu.matmul %5, %6, %cst_4 {dimension_numbers = #tpu.dot_dimension_numbers<[1], [0], [0], [1], [0, 0, 1, 1], [], []>} : vector<16x32xf32>, vector<32x64xf32>, vector<16x64xf32> -> vector<16x64xf32>
    %c0_5 = arith.constant 0 : index
    %c0_6 = arith.constant 0 : index
    %8 = vector.load %arg4[%c0_5, %c0_6] : memref<1x64xf32, #tpu.memory_space<vmem>>, vector<1x64xf32>
    %9 = vector.broadcast %8 : vector<1x64xf32> to vector<16x64xf32>
    %10 = arith.addf %7, %9 : vector<16x64xf32>
    %11 = arith.mulf %10, %10 : vector<16x64xf32>
    %12 = arith.mulf %10, %11 : vector<16x64xf32>
    %cst_7 = arith.constant 4.471500e-02 : f32
    %13 = vector.broadcast %cst_7 : f32 to vector<16x64xf32>
    %14 = arith.mulf %13, %12 : vector<16x64xf32>
    %15 = arith.addf %10, %14 : vector<16x64xf32>
    %cst_8 = arith.constant 0.797884583 : f32
    %16 = vector.broadcast %cst_8 : f32 to vector<16x64xf32>
    %17 = arith.mulf %16, %15 : vector<16x64xf32>
    %18 = math.tanh %17 : vector<16x64xf32>
    %cst_9 = arith.constant 1.000000e+00 : f32
    %19 = vector.broadcast %cst_9 : f32 to vector<16x64xf32>
    %20 = arith.addf %19, %18 : vector<16x64xf32>
    %cst_10 = arith.constant 5.000000e-01 : f32
    %21 = vector.broadcast %cst_10 : f32 to vector<16x64xf32>
    %22 = arith.mulf %21, %20 : vector<16x64xf32>
    %23 = arith.mulf %10, %22 : vector<16x64xf32>
    %c0_11 = arith.constant 0 : index
    %c0_12 = arith.constant 0 : index
    %24 = vector.load %arg10[%c0_11, %c0_12] : memref<16x32xf32, #tpu.memory_space<vmem>>, vector<16x32xf32>
    %c0_13 = arith.constant 0 : index
    %c0_14 = arith.constant 0 : index
    %25 = vector.load %arg5[%c0_13, %c0_14] : memref<64x32xf32, #tpu.memory_space<vmem>>, vector<64x32xf32>
    %cst_15 = arith.constant dense<0.000000e+00> : vector<16x32xf32>
    %26 = tpu.matmul %23, %25, %cst_15 {dimension_numbers = #tpu.dot_dimension_numbers<[1], [0], [0], [1], [0, 0, 1, 1], [], []>} : vector<16x64xf32>, vector<64x32xf32>, vector<16x32xf32> -> vector<16x32xf32>
    %27 = arith.addf %24, %26 : vector<16x32xf32>
    %c0_16 = arith.constant 0 : index
    %c0_17 = arith.constant 0 : index
    %28 = vector.load %arg10[%c0_16, %c0_17] : memref<16x32xf32, #tpu.memory_space<vmem>>, vector<16x32xf32>
    tpu.vector_store %arg10[%c0_16, %c0_17], %27 {strides = array<i32>} : memref<16x32xf32, #tpu.memory_space<vmem>>, vector<16x32xf32>,
    %c0_i32_18 = arith.constant 0 : i32
    %29 = arith.cmpi eq, %arg1, %c0_i32_18 : i32
    %30 = arith.extui %29 : i1 to i32
    %c0_i32_19 = arith.constant 0 : i32
    %31 = arith.cmpi ne, %30, %c0_i32_19 : i32
    scf.if %31 {
      %c0_20 = arith.constant 0 : index
      %c0_21 = arith.constant 0 : index
      %32 = vector.load %arg10[%c0_20, %c0_21] : memref<16x32xf32, #tpu.memory_space<vmem>>, vector<16x32xf32>
      %c0_22 = arith.constant 0 : index
      %c0_23 = arith.constant 0 : index
      %33 = vector.load %arg6[%c0_22, %c0_23] : memref<1x32xf32, #tpu.memory_space<vmem>>, vector<1x32xf32>
      %34 = vector.broadcast %33 : vector<1x32xf32> to vector<16x32xf32>
      %35 = arith.addf %32, %34 : vector<16x32xf32>
      %36 = arith.addf %35, %5 : vector<16x32xf32>
      %cst_24 = arith.constant dense<0.000000e+00> : vector<16xf32>
      %37 = vector.multi_reduction <add>, %36, %cst_24 [1] : vector<16x32xf32> to vector<16xf32>
      %38 = vector.shape_cast %37 : vector<16xf32> to vector<16x1xf32>
      %cst_25 = arith.constant 3.200000e+01 : f32
      %39 = vector.broadcast %cst_25 : f32 to vector<16x1xf32>
      %40 = arith.divf %38, %39 : vector<16x1xf32>
      %41 = vector.broadcast %40 : vector<16x1xf32> to vector<16x32xf32>
      %42 = arith.subf %36, %41 : vector<16x32xf32>
      %43 = arith.mulf %42, %42 : vector<16x32xf32>
      %cst_26 = arith.constant dense<0.000000e+00> : vector<16xf32>
      %44 = vector.multi_reduction <add>, %43, %cst_26 [1] : vector<16x32xf32> to vector<16xf32>
      %45 = vector.shape_cast %44 : vector<16xf32> to vector<16x1xf32>
      %cst_27 = arith.constant 3.200000e+01 : f32
      %46 = vector.broadcast %cst_27 : f32 to vector<16x1xf32>
      %47 = arith.divf %45, %46 : vector<16x1xf32>
      %48 = vector.broadcast %40 : vector<16x1xf32> to vector<16x32xf32>
      %49 = arith.subf %36, %48 : vector<16x32xf32>
      %cst_28 = arith.constant 9.99999974E-6 : f32
      %50 = vector.broadcast %cst_28 : f32 to vector<16x1xf32>
      %51 = arith.addf %47, %50 : vector<16x1xf32>
      %52 = math.rsqrt %51 : vector<16x1xf32>
      %53 = vector.broadcast %52 : vector<16x1xf32> to vector<16x32xf32>
      %54 = arith.mulf %49, %53 : vector<16x32xf32>
      %c0_29 = arith.constant 0 : index
      %c0_30 = arith.constant 0 : index
      %55 = vector.load %arg7[%c0_29, %c0_30] : memref<1x32xf32, #tpu.memory_space<vmem>>, vector<1x32xf32>
      %56 = vector.broadcast %55 : vector<1x32xf32> to vector<16x32xf32>
      %57 = arith.mulf %54, %56 : vector<16x32xf32>
      %c0_31 = arith.constant 0 : index
      %c0_32 = arith.constant 0 : index
      %58 = vector.load %arg8[%c0_31, %c0_32] : memref<1x32xf32, #tpu.memory_space<vmem>>, vector<1x32xf32>
      %59 = vector.broadcast %58 : vector<1x32xf32> to vector<16x32xf32>
      %60 = arith.addf %57, %59 : vector<16x32xf32>
      %c0_33 = arith.constant 0 : index
      %c0_34 = arith.constant 0 : index
      %61 = vector.load %arg9[%c0_33, %c0_34] : memref<16x32xf32, #tpu.memory_space<vmem>>, vector<16x32xf32>
      tpu.vector_store %arg9[%c0_33, %c0_34], %60 {strides = array<i32>} : memref<16x32xf32, #tpu.memory_space<vmem>>, vector<16x32xf32>,
    } else {
    }
    return
  }
  func.func @transform_0(%arg0: i32, %arg1: i32) -> (i32, i32) {
    %c0_i32 = arith.constant 0 : i32
    %c0_i32_0 = arith.constant 0 : i32
    return %arg0, %c0_i32 : i32, i32
  }
  func.func @transform_1(%arg0: i32, %arg1: i32) -> (i32, i32) {
    %c0_i32 = arith.constant 0 : i32
    %c0_i32_0 = arith.constant 0 : i32
    return %c0_i32, %arg1 : i32, i32
  }
  func.func @transform_2(%arg0: i32, %arg1: i32) -> (i32, i32) {
    %c0_i32 = arith.constant 0 : i32
    %c0_i32_0 = arith.constant 0 : i32
    return %c0_i32, %arg1 : i32, i32
  }
  func.func @transform_3(%arg0: i32, %arg1: i32) -> (i32, i32) {
    %c0_i32 = arith.constant 0 : i32
    %c0_i32_0 = arith.constant 0 : i32
    return %arg1, %c0_i32 : i32, i32
  }
  func.func @transform_4(%arg0: i32, %arg1: i32) -> (i32, i32) {
    %c0_i32 = arith.constant 0 : i32
    %c0_i32_0 = arith.constant 0 : i32
    %c0_i32_1 = arith.constant 0 : i32
    return %c0_i32, %c0_i32_0 : i32, i32
  }
  func.func @transform_5(%arg0: i32, %arg1: i32) -> (i32, i32) {
    %c0_i32 = arith.constant 0 : i32
    %c0_i32_0 = arith.constant 0 : i32
    %c0_i32_1 = arith.constant 0 : i32
    return %c0_i32, %c0_i32_0 : i32, i32
  }
  func.func @transform_6(%arg0: i32, %arg1: i32) -> (i32, i32) {
    %c0_i32 = arith.constant 0 : i32
    %c0_i32_0 = arith.constant 0 : i32
    %c0_i32_1 = arith.constant 0 : i32
    return %c0_i32, %c0_i32_0 : i32, i32
  }
  func.func @transform_7(%arg0: i32, %arg1: i32) -> (i32, i32) {
    %c0_i32 = arith.constant 0 : i32
    %c0_i32_0 = arith.constant 0 : i32
    return %arg0, %c0_i32 : i32, i32
  }
}

</mosaic_0001>

<bundles_post_ra>
// kernel: transformer_encoder.6
= control target key start
LH: loop header
LB: loop body
LE: loop exit
PB: predicated region body
PF: predicated region fallthrough
CT: control target
= control target key end

     0   :  { %15 = vsyncpa [#allocation3], 0  ;;  %s443_s0 = inlined_call_operand.hbm [shape: f32[16,32], index: 0, kind: input, shape index: {}]   ;;  %s444_s1 = inlined_call_operand.hbm [shape: f32[32,32], index: 1, kind: input, shape index: {}]   ;;  %s445_s2 = inlined_call_operand.hbm [shape: f32[32,32], index: 2, kind: input, shape index: {}]   ;;  %s446_s3 = inlined_call_operand.hbm [shape: f32[32,32], index: 3, kind: input, shape index: {}]   ;;  %s447_s4 = inlined_call_operand.vmem [shape: f32[1,32], index: 4, kind: input, shape index: {}]   ;;  %s448_s5 = inlined_call_operand.vmem [shape: f32[1,32], index: 5, kind: input, shape index: {}]   ;;  %s449_s6 = inlined_call_operand.vmem [shape: f32[1,32], index: 6, kind: input, shape index: {}]   ;;  %s450_s7 = inlined_call_operand.vmem [shape: f32[16,32], index: 7, kind: output, shape index: {0}]   ;;  %s451_s8 = inlined_call_operand.vmem [shape: f32[16,32], index: 8, kind: output, shape index: {1}]   ;;  %s452_s9 = inlined_call_operand.vmem [shape: f32[16,32], index: 9, kind: output, shape index: {2}]  }
   0x1   :  { %16 = vsyncpa [#allocation5], 0 }
   0x2   :  { %17 = vsyncpa [#allocation8], 0  ;;  %s35_s11 = sshll.u32 %s444_s1, 4  ;;  %s336_s12 = smov [#allocation4]   ;;  %s36_s11 = int_to_ptr.hbm [resolvable:$true] %s35_s11 }
   0x3   :  { %s37_s13 = sshll.u32 %s336_s12, 4  ;;  %s22_s16 = sshll.u32 %s443_s0, 4  ;;  %s38_s13 = int_to_ptr.vmem [resolvable:$true] %s37_s13  ;;  %s23_s16 = int_to_ptr.hbm [resolvable:$true] %s22_s16 }
   0x4   :  { %s337_s17 = smov 128   ;;  %s338_s18 = smov 8  }
   0x5   :  { %43 = dma.hbm_to_vmem [thread:$0]  %s36_s11, 512, %s38_s13, [#allocation5], %s337_s17, %s337_s17, %s338_s18  }
   0x6   :  { %s339_s19 = smov [#allocation2]   ;;  %s48_s23 = sshll.u32 %s445_s2, 4  ;;  %s49_s23 = int_to_ptr.hbm [resolvable:$true] %s48_s23 }
   0x7   :  { %s24_s20 = sshll.u32 %s339_s19, 4  ;;  %s61_s25 = sshll.u32 %s446_s3, 4  ;;  %s25_s20 = int_to_ptr.vmem [resolvable:$true] %s24_s20  ;;  %s62_s25 = int_to_ptr.hbm [resolvable:$true] %s61_s25 }
   0x8   :  { %30 = dma.hbm_to_vmem [thread:$0]  %s23_s16, 256, %s25_s20, [#allocation3], %s337_s17, %s337_s17, %s338_s18  }
   0x9   :  { %s340_s26 = smov [#allocation6]   ;;  %s341_s0 = smov [#allocation7]  }
   0xa   :  { %s50_s27 = sshll.u32 %s340_s26, 4  ;;  %s63_s28 = sshll.u32 %s341_s0, 4  ;;  %s51_s27 = int_to_ptr.vmem [resolvable:$true] %s50_s27  ;;  %s64_s28 = int_to_ptr.vmem [resolvable:$true] %s63_s28 }
   0xb   :  { %56 = dma.hbm_to_vmem [thread:$0]  %s49_s23, 512, %s51_s27, [#allocation5], %s337_s17, %s337_s17, %s338_s18  }
   0xc   :  { %69 = dma.hbm_to_vmem [thread:$0]  %s62_s25, 512, %s64_s28, [#allocation8], %s337_s17, %s337_s17, %s338_s18  }
   0xd   :  { %330 = dma.done.wait [#allocation3], 256  }
   0xe   :  { %331 = vsyncadd [#allocation3], 4294967040 }
   0xf   :  { %332 = dma.done.wait [#allocation5], 1024  }
  0x10   :  { %333 = vsyncadd [#allocation5], 4294966272 }
  0x11   :  { %334 = dma.done.wait [#allocation8], 512  }
  0x12   :  { %335 = vsyncadd [#allocation8], 4294966784  ;;  %v170_v0 = vld [vmem:[#allocation7 + $0x18] sm:$0xff]  ;;  %v169_v1 = vld [vmem:[#allocation7 + $0x10] sm:$0xff]  ;;  %vm102_vm0 = vcmask 261120  }
  0x13   :  { %187 = vmatpush.msra.mxu2 %v170_v0  ;;  %v168_v2 = vld [vmem:[#allocation7 + $0x8] sm:$0xff]  ;;  %v137_v3 = vld [vmem:[#allocation6 + $0x18] sm:$0xff]  ;;  %v136_v5 = vld [vmem:[#allocation6 + $0x10] sm:$0xff] }
  0x14   :  { %154 = vmatpush.msra.mxu1 %v137_v3  ;;  %v97_v4 = vld [vmem:[#allocation4 + $0x18] sm:$0xff]  ;;  %v96_v6 = vld [vmem:[#allocation4 + $0x10] sm:$0xff]  ;;  %v167_v7 = vld [vmem:[#allocation7] sm:$0xff] }
  0x15   :  { %188 = vmatpush.msra.mxu2 %v169_v1  ;;  %221 = vmatpush.msra.mxu3 %v97_v4  ;;  %v135_v8 = vld [vmem:[#allocation6 + $0x8] sm:$0xff]  ;;  %v92_v9 = vld [vmem:[#allocation2] sm:$0xff]  ;;  %v134_v11 = vld [vmem:[#allocation6] sm:$0xff] }
  0x16   :  { %155 = vmatpush.msra.mxu1 %v136_v5  ;;  %v95_v10 = vld [vmem:[#allocation4 + $0x8] sm:$0xff]  ;;  %121 = vmatpush.msra.mxu0 %v97_v4  ;;  %v94_v12 = vld [vmem:[#allocation4] sm:$0xff]  ;;  %v93_v13 = vld [vmem:[#allocation2 + $0x8] sm:$0xff] }
  0x17   :  { %189 = vmatpush.msra.mxu2 %v168_v2  ;;  %222 = vmatpush.msra.mxu3 %v96_v6  ;;  %v231_v14 = vld [vmem:[%s448_s5] ss:$0 sm:$0xff] }
  0x18   :  { %156 = vmatpush.msra.mxu1 %v135_v8  ;;  %122 = vmatpush.msra.mxu0 %v96_v6  ;;  %v233_v17 = vld [vmem:[%s447_s4] ss:$0 sm:$0xff] }
  0x19   :  { %190 = vmatpush.msra.mxu2 %v167_v7  ;;  %223 = vmatpush.msra.mxu3 %v95_v10  ;;  %v232_v18 = vld [vmem:[%s449_s6] ss:$0 sm:$0xff] }
  0x1a   :  { %219 = vmatmul.msk.f32.vlgmr.msra.gmra.mxu2 %vm102_vm0, %v92_v9  ;;  %157 = vmatpush.msra.mxu1 %v134_v11 }
  0x1b   :  { %217 = vmatmul.msk.f32.vlgmr.msra.gmra.mxu1 %vm102_vm0, %v92_v9  ;;  %224 = vmatpush.msra.mxu3 %v94_v12 }
  0x1c   :  { %216 = vmatmul.msk.f32.vlgmr.msra.gmra.mxu3 %vm102_vm0, %v93_v13  ;;  %123 = vmatpush.msra.mxu0 %v95_v10 }
  0x1e   :  { %124 = vmatpush.msra.mxu0 %v94_v12 }
  0x1f   :  { %215 = vmatmul.msk.f32.vlgmr.msra.gmra.mxu0 %vm102_vm0, %v92_v9 }
  0x22   :  { %220 = vmatmul.msk.f32.gmra.mxu2 %vm102_vm0, %v93_v13 }
  0x23   :  { %218 = vmatmul.msk.f32.gmra.mxu1 %vm102_vm0, %v93_v13 }
  0x98   :  { %v159_v15 = vpop.f32.mrf.mxu1 }
  0x99   :  { %v160_v16 = vadd.f32 %v231_v14, %v159_v15 }
  0x9b   :  { %165 = vst.msk [vmem:[%s451_s8] sm:$0xff] %vm102_vm0, %v160_v16 }
  0x9c   :  { %v126_v19 = vpop.f32.mrf.mxu0 }
  0x9d   :  { %v192_v20 = vpop.f32.mrf.mxu2  ;;  %v127_v21 = vadd.f32 %v233_v17, %v126_v19 }
  0x9e   :  { %v193_v22 = vadd.f32 %v232_v18, %v192_v20 }
  0x9f   :  { %132 = vst.msk [vmem:[%s450_s7] sm:$0xff] %vm102_vm0, %v127_v21  ;;  %v129_v23 = vpop.f32.mrf.mxu3 }
  0xa0   :  { %198 = vst.msk [vmem:[%s452_s9] sm:$0xff] %vm102_vm0, %v193_v22  ;;  %v130_v24 = vadd.f32 %v233_v17, %v129_v23  ;;  %v162_v25 = vpop.f32.mrf.mxu1 }
  0xa1   :  { %v163_v26 = vadd.f32 %v231_v14, %v162_v25 }
  0xa2   :  { %133 = vst.msk [vmem:[%s450_s7 + $0x8] sm:$0xff] %vm102_vm0, %v130_v24 }
  0xa3   :  { %166 = vst.msk [vmem:[%s451_s8 + $0x8] sm:$0xff] %vm102_vm0, %v163_v26 }
  0xa5   :  { %v195_v27 = vpop.f32.mrf.mxu2 }
  0xa6   :  { %v196_v28 = vadd.f32 %v232_v18, %v195_v27 }
  0xa8   :  { %199 = vst.msk [vmem:[%s452_s9 + $0x8] sm:$0xff] %vm102_vm0, %v196_v28 }
  0xa9   :  { %212 = vsyncpa [#allocation3], 1 }
  0xaa   :  { %213 = vsyncpa [#allocation5], 1 }
  0xab   :  { %214 = vsyncpa [#allocation8], 1 }

// kernel: transformer_encoder.8
= control target key start
LH: loop header
LB: loop body
LE: loop exit
PB: predicated region body
PF: predicated region fallthrough
CT: control target
= control target key end

     0   :  { %vm30_vm0 = vcmask 261120   ;;  %v251_v19 = vmov 0.0   ;;  %vm103_vm1 = vcmask 523264   ;;  %v252_v55 = vmov 32.0   ;;  %s373_s1 = inlined_call_operand.vmem [shape: f32[32,64], index: 1, kind: input, shape index: {}]   ;;  %s374_s0 = inlined_call_operand.vmem [shape: f32[16,32], index: 0, kind: input, shape index: {}]   ;;  %s375_s2 = inlined_call_operand.vmem [shape: f32[1,64], index: 2, kind: input, shape index: {}]   ;;  %s376_s3 = inlined_call_operand.vmem [shape: f32[64,32], index: 3, kind: input, shape index: {}]   ;;  %s377_s4 = inlined_call_operand.vmem [shape: f32[1,32], index: 4, kind: input, shape index: {}]   ;;  %s378_s5 = inlined_call_operand.vmem [shape: f32[1,32], index: 5, kind: input, shape index: {}]   ;;  %s379_s6 = inlined_call_operand.vmem [shape: f32[1,32], index: 6, kind: input, shape index: {}]   ;;  %s380_s7 = inlined_call_operand.vmem [shape: f32[16,32], index: 7, kind: output, shape index: {}]  }
   0x1   :  { %v40_v0 = vld [vmem:[%s373_s1 + $0x18] sm:$0xff]  ;;  %v39_v1 = vld [vmem:[%s373_s1 + $0x10] sm:$0xff]  ;;  %v33_v2 = vld [vmem:[%s374_s0] sm:$0xff]  ;;  %31 = vst.msk [vmem:[#allocation2] sm:$0xff] %vm30_vm0, %v251_v19 }
   0x2   :  { %64 = vmatpush.msra.mxu0 %v40_v0  ;;  %223 = vmatpush.msra.mxu3 %v40_v0  ;;  %v34_v3 = vld [vmem:[%s374_s0 + $0x8] sm:$0xff]  ;;  %v37_v5 = vld [vmem:[%s373_s1] sm:$0xff]  ;;  %v311_v6 = vmul.f32 2.0, %v33_v2  ;;  %v102_v8 = vld [vmem:[%s376_s3 + $0x38] sm:$0xff]  ;;  %32 = vst.msk [vmem:[#allocation2 + $0x8] sm:$0xff] %vm30_vm0, %v251_v19 }
   0x3   :  { %v38_v4 = vld [vmem:[%s373_s1 + $0x8] sm:$0xff]  ;;  %v313_v7 = vmul.f32 2.0, %v34_v3  ;;  %118 = vmatpush.msra.mxu1 %v102_v8  ;;  %227 = vmatpush.msra.mxu2 %v102_v8  ;;  %v101_v9 = vld [vmem:[%s376_s3 + $0x30] sm:$0xff]  ;;  %v99_v11 = vld [vmem:[%s376_s3 + $0x20] sm:$0xff] }
   0x4   :  { %65 = vmatpush.msra.mxu0 %v39_v1  ;;  %224 = vmatpush.msra.mxu3 %v39_v1  ;;  %v100_v10 = vld [vmem:[%s376_s3 + $0x28] sm:$0xff]  ;;  %v98_v12 = vld [vmem:[%s376_s3 + $0x18] sm:$0xff]  ;;  %v97_v13 = vld [vmem:[%s376_s3 + $0x10] sm:$0xff] }
   0x5   :  { %119 = vmatpush.msra.mxu1 %v101_v9  ;;  %228 = vmatpush.msra.mxu2 %v101_v9  ;;  %v96_v14 = vld [vmem:[%s376_s3 + $0x8] sm:$0xff]  ;;  %v95_v15 = vld [vmem:[%s376_s3] sm:$0xff] }
   0x6   :  { %66 = vmatpush.msra.mxu0 %v38_v4  ;;  %225 = vmatpush.msra.mxu3 %v38_v4  ;;  %v237_v16 = vld [vmem:[%s375_s2] ss:$0 sm:$0xff] }
   0x7   :  { %120 = vmatpush.msra.mxu1 %v100_v10  ;;  %229 = vmatpush.msra.mxu2 %v100_v10  ;;  %v238_v43 = vld [vmem:[%s377_s4] ss:$0 sm:$0xff] }
   0x8   :  { %67 = vmatpush.msra.mxu0 %v37_v5  ;;  %226 = vmatpush.msra.mxu3 %v37_v5  ;;  %v93_v40 = vld [vmem:[#allocation2] sm:$0xff] }
   0x9   :  { %219 = vmatmul.msk.f32.vlgmr.msra.gmra.mxu0 %vm30_vm0, %v311_v6  ;;  %220 = vmatmul.msk.f32.vlgmr.msra.gmra.mxu3 %vm30_vm0, %v313_v7  ;;  %v94_v44 = vld [vmem:[#allocation2 + $0x8] sm:$0xff] }
   0xa   :  { %121 = vmatpush.msra.mxu1 %v99_v11  ;;  %230 = vmatpush.msra.mxu2 %v99_v11 }
   0xc   :  { %122 = vmatpush.msra.mxu1 %v98_v12  ;;  %231 = vmatpush.msra.mxu2 %v98_v12 }
   0xe   :  { %123 = vmatpush.msra.mxu1 %v97_v13  ;;  %232 = vmatpush.msra.mxu2 %v97_v13 }
  0x10   :  { %124 = vmatpush.msra.mxu1 %v96_v14  ;;  %233 = vmatpush.msra.mxu2 %v96_v14 }
  0x12   :  { %125 = vmatpush.msra.mxu1 %v95_v15  ;;  %234 = vmatpush.msra.mxu2 %v95_v15 }
  0x86   :  { %v69_v17 = vpop.f32.mrf.mxu0 }
  0x87   :  { %v70_v18 = vadd.f32 %v237_v16, %v69_v17 }
  0x89   :  { %v75_v20 = vmul.f32 %v70_v18, %v70_v18 }
  0x8b   :  { %v77_v21 = vmul.f32 %v75_v20, %v70_v18  ;;  %v239_v20 = vld [vmem:[%s378_s5] ss:$0 sm:$0xff] }
  0x8c   :  { %v72_v22 = vpop.f32.mrf.mxu3 }
  0x8d   :  { %v79_v23 = vmul.f32 0.044715, %v77_v21  ;;  %v73_v24 = vadd.f32 %v237_v16, %v72_v22 }
  0x8f   :  { %v81_v25 = vadd.f32 %v79_v23, %v70_v18  ;;  %v76_v26 = vmul.f32 %v73_v24, %v73_v24  ;;  %v240_v23 = vld [vmem:[%s379_s6] ss:$0 sm:$0xff] }
  0x91   :  { %v78_v27 = vmul.f32 %v76_v26, %v73_v24  ;;  %v83_v28 = vmul.f32 0.7978846, %v81_v25 }
  0x93   :  { %v80_v29 = vmul.f32 0.044715, %v78_v27  ;;  %241 = vtanh.f32 %v83_v28 }
  0x95   :  { %v82_v30 = vadd.f32 %v80_v29, %v73_v24 }
  0x97   :  { %v84_v31 = vmul.f32 0.7978846, %v82_v30 }
  0x99   :  { %v242_v32 = vpop.eup %241  ;;  %243 = vtanh.f32 %v84_v31 }
  0x9a   :  { %v87_v33 = vadd.f32 1.0, %v242_v32  ;;  %245 = vrcp.f32 %v252_v55 }
  0x9c   :  { %v89_v34 = vmul.f32 0.5, %v87_v33 }
  0x9e   :  { %v91_v35 = vmul.f32 %v89_v34, %v70_v18 }
  0x9f   :  { %v244_v36 = vpop.eup %243 }
  0xa0   :  { %221 = vmatmul.msk.f32.vlgmr.msra.gmra.mxu1 %vm103_vm1, %v91_v35  ;;  %v88_v37 = vadd.f32 1.0, %v244_v36  ;;  %v246_v56 = vpop.eup %245 }
  0xa1   :  { %v157_v57 = vmul.f32 32.0, %v246_v56  ;;  %vm161_vm2 = vweird.f32 %v246_v56 }
  0xa2   :  { %v90_v38 = vmul.f32 0.5, %v88_v37 }
  0xa3   :  { %v158_v58 = vsub.f32 1.0, %v157_v57 }
  0xa4   :  { %v92_v39 = vmul.f32 %v90_v38, %v73_v24 }
  0xa5   :  { %v159_v59 = vmul.f32 %v246_v56, %v158_v58 }
  0xa6   :  { %222 = vmatmul.msk.f32.vlgmr.msra.gmra.mxu2 %vm103_vm1, %v92_v39 }
  0xa7   :  { %v160_v60 = vadd.f32 %v246_v56, %v159_v59 }
  0xa9   :  { %v162_v61 = vsel %vm161_vm2, %v246_v56, %v160_v60 }
 0x11d   :  { %v127_v41 = vpop.f32.mrf.mxu1 }
 0x11e   :  { %v133_v42 = vadd.f32 %v127_v41, %v93_v40 }
 0x120   :  { %135 = vst.msk [vmem:[#allocation2] sm:$0xff] %vm30_vm0, %v133_v42 }
 0x127   :  { %v140_v45 = vld [vmem:[#allocation2] sm:$0xff] }
 0x128   :  { %v146_v46 = vadd.f32 %v238_v43, %v140_v45 }
 0x129   :  { %v130_v47 = vpop.f32.mrf.mxu2 }
 0x12a   :  { %v134_v48 = vadd.f32 %v130_v47, %v94_v44  ;;  %v148_v49 = vadd.f32 %v146_v46, %v311_v6 }
 0x12c   :  { %136 = vst.msk [vmem:[#allocation2 + $0x8] sm:$0xff] %vm30_vm0, %v134_v48  ;;  %v150_v50 = vsel %vm30_vm0, %v148_v49, 0.0 }
 0x12d   :  { %151 = vadd.xlane.f32.xlu0 %v150_v50 }
 0x133   :  { %v141_v51 = vld [vmem:[#allocation2 + $0x8] sm:$0xff] }
 0x134   :  { %v147_v52 = vadd.f32 %v238_v43, %v141_v51 }
 0x136   :  { %v149_v53 = vadd.f32 %v147_v52, %v313_v7 }
 0x138   :  { %v153_v54 = vsel %vm30_vm0, %v149_v53, 0.0 }
 0x139   :  { %154 = vadd.xlane.f32.xlu0 %v153_v54 }
 0x1a0   :  { %v152_v62 = vpop.xlane.xlu0 %151 }
 0x1a1   :  { %v163_v63 = vmul.f32 %v162_v61, %v152_v62 }
 0x1a3   :  { %v165_v0 = vsub.f32 %v148_v49, %v163_v63 }
 0x1a5   :  { %v167_v1 = vmul.f32 %v165_v0, %v165_v0 }
 0x1a7   :  { %v169_v2 = vsel %vm30_vm0, %v167_v1, 0.0 }
 0x1a8   :  { %170 = vadd.xlane.f32.xlu1 %v169_v2 }
 0x1ac   :  { %v155_v3 = vpop.xlane.xlu0 %154 }
 0x1ad   :  { %v164_v4 = vmul.f32 %v162_v61, %v155_v3 }
 0x1af   :  { %v166_v5 = vsub.f32 %v149_v53, %v164_v4 }
 0x1b1   :  { %v168_v6 = vmul.f32 %v166_v5, %v166_v5 }
 0x1b3   :  { %v172_v7 = vsel %vm30_vm0, %v168_v6, 0.0 }
 0x1b4   :  { %173 = vadd.xlane.f32.xlu1 %v172_v7 }
 0x21b   :  { %v171_v8 = vpop.xlane.xlu1 %170 }
 0x21c   :  { %v175_v9 = vmul.f32 %v171_v8, %v162_v61 }
 0x21e   :  { %v177_v10 = vadd.f32 1e-05, %v175_v9 }
 0x220   :  { %247 = vrsqrt.f32 %v177_v10  ;;  %vm185_vm4 = vweird.f32 %v177_v10 }
 0x226   :  { %v248_v11 = vpop.eup %247 }
 0x227   :  { %v180_v12 = vmul.f32 %v248_v11, %v177_v10  ;;  %v174_v13 = vpop.xlane.xlu1 %173  ;;  %vm186_vm3 = vweird.f32 %v248_v11 }
 0x228   :  { %v176_v14 = vmul.f32 %v174_v13, %v162_v61  ;;  %vm187_vm5 = vmor %vm185_vm4, %vm186_vm3 }
 0x229   :  { %v181_v15 = vmul.f32 %v248_v11, %v180_v12 }
 0x22a   :  { %v178_v16 = vadd.f32 1e-05, %v176_v14 }
 0x22b   :  { %v182_v17 = vmul.f32 0.5, %v181_v15 }
 0x22c   :  { %249 = vrsqrt.f32 %v178_v16  ;;  %vm195_vm7 = vweird.f32 %v178_v16 }
 0x22d   :  { %v183_v18 = vsub.f32 1.5, %v182_v17 }
 0x22f   :  { %v184_v19 = vmul.f32 %v248_v11, %v183_v18 }
 0x231   :  { %v188_v21 = vsel %vm187_vm5, %v248_v11, %v184_v19 }
 0x232   :  { %v250_v22 = vpop.eup %249  ;;  %v199_v24 = vmul.f32 %v188_v21, %v165_v0 }
 0x233   :  { %v190_v25 = vmul.f32 %v250_v22, %v178_v16  ;;  %vm196_vm6 = vweird.f32 %v250_v22 }
 0x234   :  { %v205_v26 = vmul.f32 %v239_v20, %v199_v24  ;;  %vm197_vm8 = vmor %vm195_vm7, %vm196_vm6 }
 0x235   :  { %v191_v27 = vmul.f32 %v250_v22, %v190_v25 }
 0x236   :  { %v211_v28 = vadd.f32 %v240_v23, %v205_v26 }
 0x237   :  { %v192_v29 = vmul.f32 0.5, %v191_v27 }
 0x238   :  { %213 = vst.msk [vmem:[%s380_s7] sm:$0xff] %vm30_vm0, %v211_v28 }
 0x239   :  { %v193_v30 = vsub.f32 1.5, %v192_v29 }
 0x23b   :  { %v194_v31 = vmul.f32 %v250_v22, %v193_v30 }
 0x23d   :  { %v198_v32 = vsel %vm197_vm8, %v250_v22, %v194_v31 }
 0x23e   :  { %v200_v33 = vmul.f32 %v198_v32, %v166_v5 }
 0x240   :  { %v206_v34 = vmul.f32 %v239_v20, %v200_v33 }
 0x242   :  { %v212_v35 = vadd.f32 %v240_v23, %v206_v34 }
 0x244   :  { %214 = vst.msk [vmem:[%s380_s7 + $0x8] sm:$0xff] %vm30_vm0, %v212_v35 }

// kernel: transformer_encoder.7
= control target key start
LH: loop header
LB: loop body
LE: loop exit
PB: predicated region body
PF: predicated region fallthrough
CT: control target
= control target key end

     0   :  { %s1040_s12 = smov 0   ;;  %s1042_s13 = smov 0   ;;  %s1166_s0 = inlined_call_operand.vmem [shape: f32[16,32], index: 0, kind: input, shape index: {}]   ;;  %s1167_s1 = inlined_call_operand.vmem [shape: f32[16,32], index: 1, kind: input, shape index: {}]   ;;  %s1168_s2 = inlined_call_operand.vmem [shape: f32[16,32], index: 2, kind: input, shape index: {}]   ;;  %s1169_s3 = inlined_call_operand.vmem [shape: f32[16,32], index: 3, kind: output, shape index: {}]  }
   0x1   :  { %s1044_s14 = smov 0  }
   0x2 LB: > { %s39_s15 = sadd.s32 1, %s1005_s13  ;;  %p908_p0 = scmp.ge.s32.totalorder %s1009_s14, 1  ;;  %s1009_s14 = sphi %s1044_s14, %s13_s14   ;;  %s1005_s13 = sphi %s1042_s13, %s1171_s13   ;;  %s1001_s12 = sphi %s1040_s12, %s1170_s12  }
   0x3   : > { %p41_p1 = scmp.ge.s32.totalorder %s39_s15, 2  ;;  %p211_p2 = scmp.lt.s32.totalorder %s1009_s14, 3 }
   0x5   : > { %s1173_s15 = smov (%p41_p1, %s39_s15), 0  ;;  %p212_p3 = pnand %p908_p0, %p211_p2 }
   0x6   : > { %p258_p4 = scmp.lt.s32.totalorder (!%p212_p3), %s1001_s12, 1  ;;  %s1012_s23 = smov (!%p212_p3), 112  }
   0x7   : > { %215 = sbr.rel (%p212_p3) target bundleno = 1176 (0x498), region = 32  ;;  %s1013_s24 = smov (!%p212_p3), 120  }
   0x8   : > { %s1014_s25 = smov (!%p212_p3), 104   ;;  %s1017_s29 = smov (!%p212_p3), 8  }
   0x9   : > { %s1018_s30 = smov (!%p212_p3), 16   ;;  %s1019_s4 = smov (!%p212_p3), 24  }
   0xc   : > { %s1175_s12 = smov (!%p258_p4, %s1001_s12), 1  ;;  %vm311_vm0 = vcmask 64512   ;;  %vm297_vm1 = vcmask 7168   ;;  %v1011_v2 = vmov -inf   ;;  %v1015_v5 = vmov 0  }
   0xd   : > { %s1058_s16 = sshll.u32 %s1175_s12, 3  ;;  %298 = vst.msk [vmem:[#allocation2] sm:$0xff] %vm297_vm1, %v1011_v2  ;;  %960 = vset.pattern.permute.xlu1 %v1015_v5  ;;  %961 = vset.pattern.permute.xlu2 %v1015_v5  ;;  %v1016_v6 = vmov 0.0   ;;  %vm306_vm2 = vcmask 261120   ;;  %vm493_vm15 = vcmask 130112  }
   0xe   : > { %s273_s19 = scalar_lea.vmem %s1167_s1, %s1058_s16  ;;  %s264_s22 = scalar_lea.vmem %s1166_s0, %s1058_s16  ;;  %299 = vst.msk [vmem:[#allocation2 + $0x8] sm:$0xff] %vm297_vm1, %v1011_v2  ;;  %962 = vset.pattern.permute.xlu0 %v1015_v5 }
   0xf   : > { %v309_v0 = vld [vmem:[%s273_s19] sm:$0xff]  ;;  %300 = vst.msk [vmem:[#allocation2 + $0x10] sm:$0xff] %vm297_vm1, %v1011_v2  ;;  %s282_s28 = scalar_lea.vmem %s1168_s2, %s1058_s16  ;;  %s291_s7 = scalar_lea.vmem %s1169_s3, %s1058_s16 }
  0x10   : > { %913 = vmatpush.xpose.msk.msra.mxu0 %vm311_vm0, %v309_v0  ;;  %v308_v1 = vld [vmem:[%s264_s22] sm:$0xff]  ;;  %301 = vst.msk [vmem:[#allocation2 + $0x18] sm:$0xff] %vm297_vm1, %v1011_v2  ;;  %502 = vrot.lane.b32.xlu2 %v309_v0, %s1012_s23 }
  0x11   : > { %302 = vst.msk [vmem:[#allocation3] sm:$0xff] %vm297_vm1, %v1016_v6  ;;  %v310_v12 = vld [vmem:[%s282_s28] sm:$0xff] }
  0x12   : > { %303 = vst.msk [vmem:[#allocation3 + $0x8] sm:$0xff] %vm297_vm1, %v1016_v6  ;;  %388 = vmatpush.msra.mxu1 %v310_v12 }
  0x13   : > { %914 = vmatmul.msk.f32.vlgmr.msra.gmra.mxu0 %vm311_vm0, %v308_v1  ;;  %304 = vst.msk [vmem:[#allocation3 + $0x10] sm:$0xff] %vm297_vm1, %v1016_v6 }
  0x14   : > { %305 = vst.msk [vmem:[#allocation3 + $0x18] sm:$0xff] %vm297_vm1, %v1016_v6  ;;  %v338_v7 = vld [vmem:[#allocation2] sm:$0xff] }
  0x15   : > { %v429_v29 = vld [vmem:[#allocation2 + $0x8] sm:$0xff]  ;;  %307 = vst.msk [vmem:[#allocation4] sm:$0xff] %vm306_vm2, %v1016_v6 }
  0x16   : > { %v529_v32 = vld [vmem:[#allocation2 + $0x10] sm:$0xff] }
  0x17   : > { %v629_v33 = vld [vmem:[#allocation2 + $0x18] sm:$0xff] }
  0x18   : > { %499 = vrot.lane.b32.xlu2 %v308_v1, %s1012_s23 }
  0x1c   : > { %v363_v58 = vld [vmem:[#allocation4] sm:$0xff] }
  0x20   : > { %599 = vrot.lane.b32.xlu2 %v308_v1, %s1014_s25 }
  0x6a   : > { %v503_v13 = vpop.permute.xlu2 %502 }
  0x6b   : > { %919 = vmatpush.xpose.msk.msrb.mxu1 %vm311_vm0, %v503_v13 }
  0x72   : > { %v500_v17 = vpop.permute.xlu2 %499 }
  0x7a   : > { %v600_v21 = vpop.permute.xlu2 %599 }
  0x90   : > { %v335_v3 = vpop.f32.mrf.mxu0 }
  0x91   : > { %v340_v4 = vsel %vm311_vm0, %v335_v3, -inf }
  0x92   : > { %341 = vmax.xlane.f32.xlu0 %v340_v4 }
  0xa6   : > { %402 = vrot.lane.b32.xlu0 %v309_v0, %s1013_s24 }
 0x105   : > { %v342_v8 = vpop.xlane.xlu0 %341 }
 0x106   : > { %v343_v9 = vmax.f32 %v338_v7, %v342_v8 }
 0x108   : > { %v344_v10 = vsub.f32 %v338_v7, %v343_v9  ;;  %362 = vst.msk [vmem:[#allocation2] sm:$0xff] %vm297_vm1, %v343_v9  ;;  %349 = vperm.xlu1 %960, %v343_v9   ;;  %v339_v7 = vld [vmem:[#allocation3] sm:$0xff] }
 0x10a   : > { %v345_v39 = vmul.f32 1.442695, %v344_v10 }
 0x110   : > { %399 = vrot.lane.b32.xlu1 %v308_v1, %s1013_s24 }
 0x118   : > { %602 = vrot.lane.b32.xlu1 %v309_v0, %s1014_s25  ;;  %v403_v11 = vpop.permute.xlu0 %402 }
 0x119   : > { %916 = vmatpush.xpose.msk.msra.mxu2 %vm311_vm0, %v403_v11 }
 0x17a   : > { %v350_v14 = vpop.permute.xlu1 %349 }
 0x17b   : > { %v352_v15 = vsub.f32 %v335_v3, %v350_v14 }
 0x17d   : > { %v353_v16 = vmul.f32 1.442695, %v352_v15 }
 0x17f   : > { %963 = vpow2.f32 %v353_v16 }
 0x180   : > { %965 = vpow2.f32 %v345_v39 }
 0x182   : > { %v400_v18 = vpop.permute.xlu1 %399 }
 0x183   : > { %917 = vmatmul.msk.f32.vlgmr.msra.gmra.mxu2 %vm311_vm0, %v400_v18 }
 0x185   : > { %v964_v19 = vpop.eup %963 }
 0x186   : > { %915 = vmatmul.msk.f32.vlgmr.msra.gmra.mxu1 %vm311_vm0, %v964_v19  ;;  %v966_v42 = vpop.eup %965  ;;  %v356_v44 = vsel %vm311_vm0, %v964_v19, 0.0 }
 0x187   : > { %v355_v8 = vmul.f32 %v966_v42, %v339_v7 }
 0x18a   : > { %v603_v20 = vpop.permute.xlu1 %602 }
 0x18b   : > { %922 = vmatpush.xpose.msk.msrb.mxu0 %vm311_vm0, %v603_v20 }
 0x18e   : > { %920 = vmatmul.msk.f32.vlgmr.msrb.gmra.mxu1 %vm311_vm0, %v500_v17  ;;  %923 = vmatmul.msk.f32.vlgmr.msrb.gmra.mxu0 %vm311_vm0, %v600_v21 }
 0x203   : > { %v1101_v22 = vpop.f32.mrf.mxu1 }
 0x206   : > { %v425_v23 = vpop.f32.mrf.mxu2 }
 0x207   : > { %v432_v24 = vsel %vm311_vm0, %v425_v23, -inf }
 0x208   : > { %433 = vmax.xlane.f32.xlu1 %v432_v24 }
 0x20b   : > { %v1104_v25 = vpop.f32.mrf.mxu1  ;;  %v1106_v26 = vpop.f32.mrf.mxu0 }
 0x20c   : > { %v532_v27 = vsel %vm311_vm0, %v1104_v25, -inf  ;;  %v632_v28 = vsel %vm311_vm0, %v1106_v26, -inf }
 0x20d   : > { %533 = vmax.xlane.f32.xlu2 %v532_v27  ;;  %633 = vmax.xlane.f32.xlu0 %v632_v28  ;;  %v631_v28 = vld [vmem:[#allocation3 + $0x18] sm:$0xff] }
 0x221   : > { %462 = vrot.lane.b32.xlu1 %v310_v12, %s1013_s24 }
 0x27b   : > { %v434_v30 = vpop.xlane.xlu1 %433 }
 0x27c   : > { %v435_v31 = vmax.f32 %v429_v29, %v434_v30 }
 0x27e   : > { %453 = vst.msk [vmem:[#allocation2 + $0x8] sm:$0xff] %vm297_vm1, %v435_v31  ;;  %441 = vperm.xlu2 %961, %v435_v31   ;;  %v436_v40 = vsub.f32 %v429_v29, %v435_v31 }
 0x280   : > { %v534_v34 = vpop.xlane.xlu2 %533  ;;  %v634_v35 = vpop.xlane.xlu0 %633  ;;  %v437_v41 = vmul.f32 1.442695, %v436_v40 }
 0x281   : > { %v535_v36 = vmax.f32 %v529_v32, %v534_v34  ;;  %v635_v37 = vmax.f32 %v629_v33, %v634_v35 }
 0x282   : > { %967 = vpow2.f32 %v437_v41 }
 0x283   : > { %553 = vst.msk [vmem:[#allocation2 + $0x10] sm:$0xff] %vm297_vm1, %v535_v36  ;;  %v636_v38 = vsub.f32 %v629_v33, %v635_v37  ;;  %541 = vperm.xlu0 %962, %v535_v36   ;;  %641 = vperm.xlu1 %960, %v635_v37   ;;  %v536_v45 = vsub.f32 %v529_v32, %v535_v36 }
 0x284   : > { %653 = vst.msk [vmem:[#allocation2 + $0x18] sm:$0xff] %vm297_vm1, %v635_v37 }
 0x285   : > { %v537_v46 = vmul.f32 1.442695, %v536_v45  ;;  %v637_v48 = vmul.f32 1.442695, %v636_v38 }
 0x286   : > { %562 = vrot.lane.b32.xlu2 %v310_v12, %s1012_s23 }
 0x287   : > { %969 = vpow2.f32 %v537_v46 }
 0x288   : > { %v1118_v43 = vpop.eup %967  ;;  %971 = vpow2.f32 %v637_v48 }
 0x28d   : > { %v1122_v49 = vpop.eup %969 }
 0x28e   : > { %662 = vrot.lane.b32.xlu2 %v310_v12, %s1014_s25  ;;  %v1127_v50 = vpop.eup %971 }
 0x28f   : > { %v647_v29 = vmul.f32 %v1127_v50, %v631_v28 }
 0x293   : > { %v463_v47 = vpop.permute.xlu1 %462 }
 0x294   : > { %483 = vmatpush.msra.mxu3 %v463_v47 }
 0x296   : > { %366 = vperm.xlu2 %961, %v966_v42  }
 0x29e   : > { %457 = vperm.xlu2 %961, %v1118_v43  }
 0x2ad   : > { %357 = vadd.xlane.f32.xlu1 %v356_v44 }
 0x2c6   : > { %557 = vperm.xlu1 %960, %v1122_v49  }
 0x2ce   : > { %657 = vperm.xlu1 %960, %v1127_v50  }
 0x2d8   : > { %v442_v51 = vpop.permute.xlu2 %441 }
 0x2d9   : > { %v444_v52 = vsub.f32 %v425_v23, %v442_v51 }
 0x2db   : > { %v445_v53 = vmul.f32 1.442695, %v444_v52 }
 0x2dd   : > { %973 = vpow2.f32 %v445_v53 }
 0x2e0   : > { %v563_v54 = vpop.permute.xlu2 %562 }
 0x2e1   : > { %583 = vmatpush.msrb.mxu3 %v563_v54 }
 0x2e3   : > { %v974_v55 = vpop.eup %973 }
 0x2e4   : > { %918 = vmatmul.msk.f32.vlgmr.msra.gmra.mxu3 %vm311_vm0, %v974_v55  ;;  %v448_v56 = vsel %vm311_vm0, %v974_v55, 0.0 }
 0x2e5   : > { %449 = vadd.xlane.f32.xlu0 %v448_v56 }
 0x2e8   : > { %v663_v57 = vpop.permute.xlu2 %662 }
 0x2e9   : > { %683 = vmatpush.msrb.mxu2 %v663_v57 }
 0x2f0   : > { %v367_v59 = vpop.permute.xlu2 %366 }
 0x2f1   : > { %v369_v60 = vmul.f32 %v367_v59, %v363_v58 }
 0x2f3   : > { %v393_v61 = vadd.f32 %v1101_v22, %v369_v60  ;;  %v431_v22 = vld [vmem:[#allocation3 + $0x8] sm:$0xff] }
 0x2f4   : > { %v447_v23 = vmul.f32 %v1118_v43, %v431_v22 }
 0x2f5   : > { %394 = vst.msk [vmem:[#allocation4] sm:$0xff] %vm311_vm0, %v393_v61  ;;  %v642_v62 = vpop.permute.xlu1 %641  ;;  %v542_v63 = vpop.permute.xlu0 %541 }
 0x2f6   : > { %v644_v0 = vsub.f32 %v1106_v26, %v642_v62  ;;  %v544_v1 = vsub.f32 %v1104_v25, %v542_v63 }
 0x2f8   : > { %v645_v2 = vmul.f32 1.442695, %v644_v0  ;;  %v545_v3 = vmul.f32 1.442695, %v544_v1  ;;  %v458_v57 = vpop.permute.xlu2 %457 }
 0x2fa   : > { %975 = vpow2.f32 %v645_v2 }
 0x2fb   : > { %977 = vpow2.f32 %v545_v3  ;;  %v531_v3 = vld [vmem:[#allocation3 + $0x10] sm:$0xff] }
 0x2fc   : > { %v454_v58 = vld [vmem:[#allocation4] sm:$0xff] }
 0x2fd   : > { %v460_v59 = vmul.f32 %v458_v57, %v454_v58 }
 0x300   : > { %v976_v4 = vpop.eup %975 }
 0x301   : > { %v1136_v5 = vpop.eup %977  ;;  %924 = vmatmul.msk.f32.vlgmr.msrb.gmra.mxu2 %vm311_vm0, %v976_v4  ;;  %v648_v6 = vsel %vm311_vm0, %v976_v4, 0.0  ;;  %v547_v4 = vmul.f32 %v1122_v49, %v531_v3 }
 0x302   : > { %921 = vmatmul.msk.f32.vlgmr.msrb.gmra.mxu3 %vm311_vm0, %v1136_v5  ;;  %649 = vadd.xlane.f32.xlu0 %v648_v6  ;;  %v548_v51 = vsel %vm311_vm0, %v1136_v5, 0.0 }
 0x320   : > { %v358_v9 = vpop.xlane.xlu1 %357 }
 0x321   : > { %v359_v10 = vadd.f32 %v358_v9, %v355_v8 }
 0x323   : > { %361 = vst.msk [vmem:[#allocation3] sm:$0xff] %vm297_vm1, %v359_v10 }
 0x32a   : > { %v698_v11 = vld [vmem:[#allocation3] sm:$0xff] }
 0x32b   : > { %979 = vrcp.f32 %v698_v11  ;;  %v710_v15 = vand.u32 2147483648, %v698_v11  ;;  %v708_v17 = vand.u32 2147483647, %v698_v11  ;;  %vm704_vm4 = vweird.f32 %v698_v11 }
 0x32d   : > { %v711_v19 = vor.u32 1.1754944e-38, %v710_v15  ;;  %vm709_vm6 = vcmp.eq.f32.partialorder %v708_v17, 8.507059e+37 }
 0x331   : > { %v980_v12 = vpop.eup %979 }
 0x332   : > { %v700_v13 = vmul.f32 %v980_v12, %v698_v11  ;;  %vm705_vm3 = vweird.f32 %v980_v12 }
 0x333   : > { %vm706_vm5 = vmor %vm704_vm4, %vm705_vm3  ;;  %vm593_vm3 = vcmask 195712   ;;  %vm693_vm4 = vcmask 261312  }
 0x334   : > { %v701_v14 = vsub.f32 1.0, %v700_v13 }
 0x336   : > { %v702_v16 = vmul.f32 %v980_v12, %v701_v14 }
 0x338   : > { %v703_v18 = vadd.f32 %v980_v12, %v702_v16  ;;  %v558_v63 = vpop.permute.xlu1 %557 }
 0x33a   : > { %v707_v20 = vsel %vm706_vm5, %v980_v12, %v703_v18 }
 0x33b   : > { %v712_v21 = vsel %vm709_vm6, %v711_v19, %v707_v20 }
 0x33c   : > { %716 = vperm.xlu1 %960, %v712_v21  }
 0x340   : > { %v658_v8 = vpop.permute.xlu1 %657 }
 0x358   : > { %v450_v24 = vpop.xlane.xlu0 %449 }
 0x359   : > { %v451_v25 = vadd.f32 %v450_v24, %v447_v23 }
 0x35b   : > { %452 = vst.msk [vmem:[#allocation3 + $0x8] sm:$0xff] %vm297_vm1, %v451_v25 }
 0x362   : > { %v720_v27 = vld [vmem:[#allocation3 + $0x8] sm:$0xff] }
 0x363   : > { %981 = vrcp.f32 %v720_v27  ;;  %v732_v40 = vand.u32 2147483648, %v720_v27  ;;  %vm726_vm8 = vweird.f32 %v720_v27  ;;  %v730_v42 = vand.u32 2147483647, %v720_v27 }
 0x365   : > { %v733_v45 = vor.u32 1.1754944e-38, %v732_v40  ;;  %vm731_vm10 = vcmp.eq.f32.partialorder %v730_v42, 8.507059e+37 }
 0x367   : > { %v485_v26 = vpop.f32.mrf.mxu3 }
 0x368   : > { %489 = vrot.lane.b32.xlu2 %v485_v26, %s1017_s29 }
 0x369   : > { %v982_v32 = vpop.eup %981 }
 0x36a   : > { %v722_v33 = vmul.f32 %v982_v32, %v720_v27  ;;  %vm727_vm7 = vweird.f32 %v982_v32 }
 0x36b   : > { %vm728_vm9 = vmor %vm726_vm8, %vm727_vm7  ;;  %vm784_vm8 = vcmask 130048  }
 0x36c   : > { %v723_v34 = vsub.f32 1.0, %v722_v33 }
 0x36e   : > { %v724_v36 = vmul.f32 %v982_v32, %v723_v34 }
 0x370   : > { %v725_v39 = vadd.f32 %v982_v32, %v724_v36 }
 0x372   : > { %v729_v44 = vsel %vm728_vm9, %v982_v32, %v725_v39  ;;  %vm786_vm9 = vcmask 195584  }
 0x373   : > { %v734_v47 = vsel %vm731_vm10, %v733_v45, %v729_v44 }
 0x375   : > { %v650_v30 = vpop.xlane.xlu0 %649 }
 0x376   : > { %v651_v31 = vadd.f32 %v650_v30, %v647_v29 }
 0x378   : > { %652 = vst.msk [vmem:[#allocation3 + $0x18] sm:$0xff] %vm297_vm1, %v651_v31 }
 0x37f   : > { %v762_v35 = vld [vmem:[#allocation3 + $0x18] sm:$0xff] }
 0x380   : > { %983 = vrcp.f32 %v762_v35  ;;  %v774_v50 = vand.u32 2147483648, %v762_v35  ;;  %vm768_vm12 = vweird.f32 %v762_v35  ;;  %v772_v52 = vand.u32 2147483647, %v762_v35 }
 0x382   : > { %v775_v54 = vor.u32 1.1754944e-38, %v774_v50  ;;  %vm773_vm14 = vcmp.eq.f32.partialorder %v772_v52, 8.507059e+37 }
 0x384   : > { %v685_v56 = vpop.f32.mrf.mxu2 }
 0x385   : > { %v585_v37 = vpop.f32.mrf.mxu3 }
 0x386   : > { %v984_v38 = vpop.eup %983  ;;  %589 = vrot.lane.b32.xlu0 %v585_v37, %s1018_s30 }
 0x387   : > { %v764_v41 = vmul.f32 %v984_v38, %v762_v35  ;;  %vm769_vm11 = vweird.f32 %v984_v38 }
 0x388   : > { %vm770_vm13 = vmor %vm768_vm12, %vm769_vm11 }
 0x389   : > { %v765_v43 = vsub.f32 1.0, %v764_v41 }
 0x38b   : > { %v766_v46 = vmul.f32 %v984_v38, %v765_v43 }
 0x38d   : > { %v767_v48 = vadd.f32 %v984_v38, %v766_v46 }
 0x38e   : > { %737 = vperm.xlu0 %962, %v734_v47  }
 0x38f   : > { %v771_v53 = vsel %vm770_vm13, %v984_v38, %v767_v48 }
 0x390   : > { %v776_v55 = vsel %vm773_vm14, %v775_v54, %v771_v53 }
 0x391   : > { %549 = vadd.xlane.f32.xlu2 %v548_v51 }
 0x396   : > { %779 = vperm.xlu0 %962, %v776_v55  }
 0x3a9   : > { %689 = vrot.lane.b32.xlu2 %v685_v56, %s1019_s4 }
 0x3ae   : > { %v717_v23 = vpop.permute.xlu1 %716 }
 0x3c2   : > { %v490_v60 = vpop.permute.xlu2 %489 }
 0x3c3   : > { %v492_v61 = vadd.f32 %v490_v60, %v460_v59 }
 0x3c5   : > { %494 = vst.msk [vmem:[#allocation4] sm:$0xff] %vm493_vm15, %v492_v61 }
 0x3cc   : > { %v554_v62 = vld [vmem:[#allocation4] sm:$0xff] }
 0x3cd   : > { %v560_v0 = vmul.f32 %v558_v63, %v554_v62 }
 0x3f8   : > { %v590_v1 = vpop.permute.xlu0 %589 }
 0x3f9   : > { %v592_v2 = vadd.f32 %v590_v1, %v560_v0 }
 0x3fb   : > { %594 = vst.msk [vmem:[#allocation4] sm:$0xff] %vm593_vm3, %v592_v2 }
 0x400   : > { %v738_v22 = vpop.permute.xlu0 %737 }
 0x402   : > { %v654_v7 = vld [vmem:[#allocation4] sm:$0xff] }
 0x403   : > { %v660_v9 = vmul.f32 %v658_v8, %v654_v7 }
 0x404   : > { %v550_v5 = vpop.xlane.xlu2 %549 }
 0x405   : > { %v551_v6 = vadd.f32 %v550_v5, %v547_v4 }
 0x407   : > { %552 = vst.msk [vmem:[#allocation3 + $0x10] sm:$0xff] %vm297_vm1, %v551_v6 }
 0x408   : > { %v780_v28 = vpop.permute.xlu0 %779 }
 0x40c   : > { %v690_v10 = vpop.permute.xlu2 %689 }
 0x40d   : > { %v692_v11 = vadd.f32 %v690_v10, %v660_v9 }
 0x40e   : > { %v741_v12 = vld [vmem:[#allocation3 + $0x10] sm:$0xff] }
 0x40f   : > { %694 = vst.msk [vmem:[#allocation4] sm:$0xff] %vm693_vm4, %v692_v11  ;;  %985 = vrcp.f32 %v741_v12  ;;  %v753_v16 = vand.u32 2147483648, %v741_v12  ;;  %v751_v49 = vand.u32 2147483647, %v741_v12  ;;  %vm747_vm6 = vweird.f32 %v741_v12 }
 0x411   : > { %v754_v19 = vor.u32 1.1754944e-38, %v753_v16  ;;  %vm752_vm1 = vcmp.eq.f32.partialorder %v751_v49, 8.507059e+37 }
 0x415   : > { %v986_v13 = vpop.eup %985 }
 0x416   : > { %v743_v14 = vmul.f32 %v986_v13, %v741_v12  ;;  %vm748_vm5 = vweird.f32 %v986_v13  ;;  %v713_v24 = vld [vmem:[#allocation4] sm:$0xff] }
 0x417   : > { %vm749_vm7 = vmor %vm747_vm6, %vm748_vm5  ;;  %v719_v25 = vmul.f32 %v717_v23, %v713_v24  ;;  %v740_v26 = vmul.f32 %v738_v22, %v713_v24  ;;  %v782_v30 = vmul.f32 %v780_v28, %v713_v24 }
 0x418   : > { %v744_v15 = vsub.f32 1.0, %v743_v14 }
 0x419   : > { %v783_v31 = vsel %vm311_vm0, %v719_v25, %v740_v26 }
 0x41a   : > { %v745_v17 = vmul.f32 %v986_v13, %v744_v15 }
 0x41c   : > { %v746_v18 = vadd.f32 %v986_v13, %v745_v17 }
 0x41e   : > { %v750_v20 = vsel %vm749_vm7, %v986_v13, %v746_v18 }
 0x41f   : > { %v755_v21 = vsel %vm752_vm1, %v754_v19, %v750_v20 }
 0x420   : > { %758 = vperm.xlu1 %960, %v755_v21  }
 0x492   : > { %v759_v27 = vpop.permute.xlu1 %758 }
 0x493   : > { %v761_v29 = vmul.f32 %v759_v27, %v713_v24 }
 0x495   : > { %v785_v32 = vsel %vm784_vm8, %v783_v31, %v761_v29 }
 0x496   : > { %v787_v33 = vsel %vm786_vm9, %v785_v32, %v782_v30 }
 0x497   : > { %789 = vst.msk [vmem:[%s291_s7] sm:$0xff] %vm306_vm2, %v787_v33 }
 0x498 PF: > { %s13_s14 = sadd.s32 1, %s1009_s14   ;;  %s1170_s12 = smov %s1005_s13 }
 0x499   : > { %p10_p5 = scmp.ge.s32.totalorder %s13_s14, 4   ;;  %s1171_s13 = smov %s1173_s15 }
 0x49b   :  { %12 = sbr.rel (!%p10_p5) target bundleno = 2 (0x2), region = 82 }

// kernel: transformer_encoder.9
= control target key start
LH: loop header
LB: loop body
LE: loop exit
PB: predicated region body
PF: predicated region fallthrough
CT: control target
= control target key end

     0   :  { %15 = vsyncpa [#allocation3], 0  ;;  %s369_s0 = inlined_call_operand.vmem [shape: f32[16,32], index: 0, kind: input, shape index: {}]   ;;  %s370_s1 = inlined_call_operand.vmem [shape: f32[32,32], index: 1, kind: input, shape index: {}]   ;;  %s371_s2 = inlined_call_operand.hbm [shape: f32[32,32], index: 2, kind: input, shape index: {}]   ;;  %s372_s3 = inlined_call_operand.hbm [shape: f32[32,32], index: 3, kind: input, shape index: {}]   ;;  %s373_s4 = inlined_call_operand.vmem [shape: f32[1,32], index: 4, kind: input, shape index: {}]   ;;  %s374_s5 = inlined_call_operand.vmem [shape: f32[1,32], index: 5, kind: input, shape index: {}]   ;;  %s375_s6 = inlined_call_operand.vmem [shape: f32[1,32], index: 6, kind: input, shape index: {}]   ;;  %s376_s7 = inlined_call_operand.vmem [shape: f32[16,32], index: 7, kind: output, shape index: {0}]   ;;  %s377_s8 = inlined_call_operand.vmem [shape: f32[16,32], index: 8, kind: output, shape index: {1}]   ;;  %s378_s9 = inlined_call_operand.vmem [shape: f32[16,32], index: 9, kind: output, shape index: {2}]  }
   0x1   :  { %s25_s11 = sshll.u32 %s371_s2, 4  ;;  %s26_s11 = int_to_ptr.hbm [resolvable:$true] %s25_s11 }
   0x2   :  { %16 = vsyncpa [#allocation5], 0  ;;  %s252_s12 = smov [#allocation2]   ;;  %s38_s16 = sshll.u32 %s372_s3, 4  ;;  %s39_s16 = int_to_ptr.hbm [resolvable:$true] %s38_s16 }
   0x3   :  { %s27_s13 = sshll.u32 %s252_s12, 4  ;;  %s253_s17 = smov 128   ;;  %s28_s13 = int_to_ptr.vmem [resolvable:$true] %s27_s13 }
   0x4   :  { %s254_s18 = smov 8   ;;  %s255_s19 = smov [#allocation4]  }
   0x5   :  { %33 = dma.hbm_to_vmem [thread:$0]  %s26_s11, 512, %s28_s13, [#allocation3], %s253_s17, %s253_s17, %s254_s18  }
   0x6   :  { %s40_s20 = sshll.u32 %s255_s19, 4  ;;  %s41_s20 = int_to_ptr.vmem [resolvable:$true] %s40_s20 }
   0x7   :  { %46 = dma.hbm_to_vmem [thread:$0]  %s39_s16, 512, %s41_s20, [#allocation5], %s253_s17, %s253_s17, %s254_s18  }
   0x8   :  { %248 = dma.done.wait [#allocation3], 512  }
   0x9   :  { %249 = vsyncadd [#allocation3], 4294966784 }
   0xa   :  { %250 = dma.done.wait [#allocation5], 512  }
   0xb   :  { %251 = vsyncadd [#allocation5], 4294966784  ;;  %v139_v0 = vld [vmem:[#allocation4 + $0x18] sm:$0xff]  ;;  %v138_v1 = vld [vmem:[#allocation4 + $0x10] sm:$0xff]  ;;  %vm71_vm0 = vcmask 261120  }
   0xc   :  { %156 = vmatpush.msra.mxu2 %v139_v0  ;;  %v137_v2 = vld [vmem:[#allocation4 + $0x8] sm:$0xff]  ;;  %v106_v3 = vld [vmem:[#allocation2 + $0x18] sm:$0xff]  ;;  %v105_v5 = vld [vmem:[#allocation2 + $0x10] sm:$0xff] }
   0xd   :  { %123 = vmatpush.msra.mxu1 %v106_v3  ;;  %v66_v4 = vld [vmem:[%s370_s1 + $0x18] sm:$0xff]  ;;  %v65_v6 = vld [vmem:[%s370_s1 + $0x10] sm:$0xff]  ;;  %v136_v7 = vld [vmem:[#allocation4] sm:$0xff] }
   0xe   :  { %157 = vmatpush.msra.mxu2 %v138_v1  ;;  %189 = vmatpush.msra.mxu3 %v66_v4  ;;  %v104_v8 = vld [vmem:[#allocation2 + $0x8] sm:$0xff]  ;;  %v61_v9 = vld [vmem:[%s369_s0] sm:$0xff] }
   0xf   :  { %124 = vmatpush.msra.mxu1 %v105_v5  ;;  %v64_v10 = vld [vmem:[%s370_s1 + $0x8] sm:$0xff]  ;;  %90 = vmatpush.msra.mxu0 %v66_v4  ;;  %v103_v11 = vld [vmem:[#allocation2] sm:$0xff] }
  0x10   :  { %158 = vmatpush.msra.mxu2 %v137_v2  ;;  %190 = vmatpush.msra.mxu3 %v65_v6  ;;  %v63_v12 = vld [vmem:[%s370_s1] sm:$0xff]  ;;  %v62_v13 = vld [vmem:[%s369_s0 + $0x8] sm:$0xff] }
  0x11   :  { %125 = vmatpush.msra.mxu1 %v104_v8  ;;  %91 = vmatpush.msra.mxu0 %v65_v6  ;;  %v197_v14 = vld [vmem:[%s374_s5] ss:$0 sm:$0xff] }
  0x12   :  { %159 = vmatpush.msra.mxu2 %v136_v7  ;;  %191 = vmatpush.msra.mxu3 %v64_v10  ;;  %v199_v17 = vld [vmem:[%s373_s4] ss:$0 sm:$0xff] }
  0x13   :  { %187 = vmatmul.msk.f32.vlgmr.msra.gmra.mxu2 %vm71_vm0, %v61_v9  ;;  %126 = vmatpush.msra.mxu1 %v103_v11  ;;  %v198_v18 = vld [vmem:[%s375_s6] ss:$0 sm:$0xff] }
  0x14   :  { %185 = vmatmul.msk.f32.vlgmr.msra.gmra.mxu1 %vm71_vm0, %v61_v9  ;;  %192 = vmatpush.msra.mxu3 %v63_v12 }
  0x15   :  { %184 = vmatmul.msk.f32.vlgmr.msra.gmra.mxu3 %vm71_vm0, %v62_v13  ;;  %92 = vmatpush.msra.mxu0 %v64_v10 }
  0x17   :  { %93 = vmatpush.msra.mxu0 %v63_v12 }
  0x18   :  { %183 = vmatmul.msk.f32.vlgmr.msra.gmra.mxu0 %vm71_vm0, %v61_v9 }
  0x1b   :  { %188 = vmatmul.msk.f32.gmra.mxu2 %vm71_vm0, %v62_v13 }
  0x1c   :  { %186 = vmatmul.msk.f32.gmra.mxu1 %vm71_vm0, %v62_v13 }
  0x91   :  { %v128_v15 = vpop.f32.mrf.mxu1 }
  0x92   :  { %v129_v16 = vadd.f32 %v197_v14, %v128_v15 }
  0x94   :  { %134 = vst.msk [vmem:[%s377_s8] sm:$0xff] %vm71_vm0, %v129_v16 }
  0x95   :  { %v95_v19 = vpop.f32.mrf.mxu0 }
  0x96   :  { %v161_v20 = vpop.f32.mrf.mxu2  ;;  %v96_v21 = vadd.f32 %v199_v17, %v95_v19 }
  0x97   :  { %v162_v22 = vadd.f32 %v198_v18, %v161_v20 }
  0x98   :  { %101 = vst.msk [vmem:[%s376_s7] sm:$0xff] %vm71_vm0, %v96_v21  ;;  %v98_v23 = vpop.f32.mrf.mxu3 }
  0x99   :  { %167 = vst.msk [vmem:[%s378_s9] sm:$0xff] %vm71_vm0, %v162_v22  ;;  %v99_v24 = vadd.f32 %v199_v17, %v98_v23  ;;  %v131_v25 = vpop.f32.mrf.mxu1 }
  0x9a   :  { %v132_v26 = vadd.f32 %v197_v14, %v131_v25 }
  0x9b   :  { %102 = vst.msk [vmem:[%s376_s7 + $0x8] sm:$0xff] %vm71_vm0, %v99_v24 }
  0x9c   :  { %135 = vst.msk [vmem:[%s377_s8 + $0x8] sm:$0xff] %vm71_vm0, %v132_v26 }
  0x9e   :  { %v164_v27 = vpop.f32.mrf.mxu2 }
  0x9f   :  { %v165_v28 = vadd.f32 %v198_v18, %v164_v27 }
  0xa1   :  { %168 = vst.msk [vmem:[%s378_s9 + $0x8] sm:$0xff] %vm71_vm0, %v165_v28 }
  0xa2   :  { %181 = vsyncpa [#allocation3], 1 }
  0xa3   :  { %182 = vsyncpa [#allocation5], 1 }

// kernel: transformer_encoder.11
= control target key start
LH: loop header
LB: loop body
LE: loop exit
PB: predicated region body
PF: predicated region fallthrough
CT: control target
= control target key end

     0   :  { %s417_s0 = inlined_call_operand.vmem [shape: f32[16,32], index: 0, kind: input, shape index: {}]   ;;  %s418_s1 = inlined_call_operand.vmem [shape: f32[32,64], index: 1, kind: input, shape index: {}]   ;;  %s419_s2 = inlined_call_operand.vmem [shape: f32[1,64], index: 2, kind: input, shape index: {}]   ;;  %s420_s3 = inlined_call_operand.vmem [shape: f32[64,32], index: 3, kind: input, shape index: {}]   ;;  %s421_s4 = inlined_call_operand.vmem [shape: f32[1,32], index: 4, kind: input, shape index: {}]   ;;  %s422_s5 = inlined_call_operand.vmem [shape: f32[1,32], index: 5, kind: input, shape index: {}]   ;;  %s423_s6 = inlined_call_operand.vmem [shape: f32[1,32], index: 6, kind: input, shape index: {}]   ;;  %s424_s7 = inlined_call_operand.hbm [shape: f32[16,32], index: 7, kind: output, shape index: {}]  }
   0x1   :  { %v41_v0 = vld [vmem:[%s418_s1 + $0x18] sm:$0xff]  ;;  %v40_v1 = vld [vmem:[%s418_s1 + $0x10] sm:$0xff]  ;;  %v34_v2 = vld [vmem:[%s417_s0] sm:$0xff] }
   0x2   :  { %65 = vmatpush.msra.mxu0 %v41_v0  ;;  %238 = vmatpush.msra.mxu3 %v41_v0  ;;  %v35_v3 = vld [vmem:[%s417_s0 + $0x8] sm:$0xff] }
   0x3   :  { %v39_v4 = vld [vmem:[%s418_s1 + $0x8] sm:$0xff] }
   0x4   :  { %66 = vmatpush.msra.mxu0 %v40_v1  ;;  %239 = vmatpush.msra.mxu3 %v40_v1 }
   0x5   :  { %12 = vsyncpa [#allocation4], 0  ;;  %v38_v5 = vld [vmem:[%s418_s1] sm:$0xff]  ;;  %v358_v6 = vmul.f32 2.0, %v34_v2  ;;  %v360_v7 = vmul.f32 2.0, %v35_v3  ;;  %vm31_vm0 = vcmask 261120  }
   0x6   :  { %67 = vmatpush.msra.mxu0 %v39_v4  ;;  %240 = vmatpush.msra.mxu3 %v39_v4  ;;  %v103_v8 = vld [vmem:[%s420_s3 + $0x38] sm:$0xff]  ;;  %v102_v9 = vld [vmem:[%s420_s3 + $0x30] sm:$0xff]  ;;  %v101_v10 = vld [vmem:[%s420_s3 + $0x28] sm:$0xff]  ;;  %v295_v19 = vmov 0.0   ;;  %vm104_vm1 = vcmask 523264   ;;  %v296_v55 = vmov 32.0  }
   0x7   :  { %119 = vmatpush.msra.mxu1 %v103_v8  ;;  %242 = vmatpush.msra.mxu2 %v103_v8  ;;  %v100_v11 = vld [vmem:[%s420_s3 + $0x20] sm:$0xff]  ;;  %v99_v12 = vld [vmem:[%s420_s3 + $0x18] sm:$0xff]  ;;  %v98_v13 = vld [vmem:[%s420_s3 + $0x10] sm:$0xff]  ;;  %32 = vst.msk [vmem:[#allocation2] sm:$0xff] %vm31_vm0, %v295_v19  ;;  %s298_s12 = smov 128   ;;  %s299_s0 = smov 8  }
   0x8   :  { %68 = vmatpush.msra.mxu0 %v38_v5  ;;  %241 = vmatpush.msra.mxu3 %v38_v5  ;;  %v97_v14 = vld [vmem:[%s420_s3 + $0x8] sm:$0xff]  ;;  %v96_v15 = vld [vmem:[%s420_s3] sm:$0xff]  ;;  %33 = vst.msk [vmem:[#allocation2 + $0x8] sm:$0xff] %vm31_vm0, %v295_v19 }
   0x9   :  { %234 = vmatmul.msk.f32.vlgmr.msra.gmra.mxu0 %vm31_vm0, %v358_v6  ;;  %235 = vmatmul.msk.f32.vlgmr.msra.gmra.mxu3 %vm31_vm0, %v360_v7  ;;  %v255_v16 = vld [vmem:[%s419_s2] ss:$0 sm:$0xff] }
   0xa   :  { %120 = vmatpush.msra.mxu1 %v102_v9  ;;  %243 = vmatpush.msra.mxu2 %v102_v9  ;;  %v256_v43 = vld [vmem:[%s421_s4] ss:$0 sm:$0xff] }
   0xc   :  { %121 = vmatpush.msra.mxu1 %v101_v10  ;;  %244 = vmatpush.msra.mxu2 %v101_v10 }
   0xe   :  { %122 = vmatpush.msra.mxu1 %v100_v11  ;;  %245 = vmatpush.msra.mxu2 %v100_v11  ;;  %v94_v40 = vld [vmem:[#allocation2] sm:$0xff] }
   0xf   :  { %v95_v44 = vld [vmem:[#allocation2 + $0x8] sm:$0xff] }
  0x10   :  { %123 = vmatpush.msra.mxu1 %v99_v12  ;;  %246 = vmatpush.msra.mxu2 %v99_v12 }
  0x12   :  { %124 = vmatpush.msra.mxu1 %v98_v13  ;;  %247 = vmatpush.msra.mxu2 %v98_v13 }
  0x14   :  { %125 = vmatpush.msra.mxu1 %v97_v14  ;;  %248 = vmatpush.msra.mxu2 %v97_v14 }
  0x16   :  { %126 = vmatpush.msra.mxu1 %v96_v15  ;;  %249 = vmatpush.msra.mxu2 %v96_v15 }
  0x86   :  { %v70_v17 = vpop.f32.mrf.mxu0 }
  0x87   :  { %v71_v18 = vadd.f32 %v255_v16, %v70_v17 }
  0x89   :  { %v76_v20 = vmul.f32 %v71_v18, %v71_v18 }
  0x8b   :  { %v78_v21 = vmul.f32 %v76_v20, %v71_v18  ;;  %v257_v20 = vld [vmem:[%s422_s5] ss:$0 sm:$0xff]  ;;  %s297_s5 = smov [#allocation3]  }
  0x8c   :  { %v73_v22 = vpop.f32.mrf.mxu3  ;;  %s220_s9 = sshll.u32 %s297_s5, 4  ;;  %s221_s9 = int_to_ptr.vmem [resolvable:$true] %s220_s9 }
  0x8d   :  { %v80_v23 = vmul.f32 0.044715, %v78_v21  ;;  %v74_v24 = vadd.f32 %v255_v16, %v73_v22 }
  0x8f   :  { %v82_v25 = vadd.f32 %v80_v23, %v71_v18  ;;  %v77_v26 = vmul.f32 %v74_v24, %v74_v24 }
  0x91   :  { %v79_v27 = vmul.f32 %v77_v26, %v74_v24  ;;  %v84_v28 = vmul.f32 0.7978846, %v82_v25 }
  0x93   :  { %v81_v29 = vmul.f32 0.044715, %v79_v27  ;;  %259 = vtanh.f32 %v84_v28 }
  0x95   :  { %v83_v30 = vadd.f32 %v81_v29, %v74_v24 }
  0x97   :  { %v85_v31 = vmul.f32 0.7978846, %v83_v30 }
  0x99   :  { %v260_v32 = vpop.eup %259  ;;  %261 = vtanh.f32 %v85_v31 }
  0x9a   :  { %v88_v33 = vadd.f32 1.0, %v260_v32  ;;  %263 = vrcp.f32 %v296_v55 }
  0x9c   :  { %v90_v34 = vmul.f32 0.5, %v88_v33 }
  0x9e   :  { %v92_v35 = vmul.f32 %v90_v34, %v71_v18 }
  0x9f   :  { %v262_v36 = vpop.eup %261 }
  0xa0   :  { %236 = vmatmul.msk.f32.vlgmr.msra.gmra.mxu1 %vm104_vm1, %v92_v35  ;;  %v89_v37 = vadd.f32 1.0, %v262_v36  ;;  %v264_v56 = vpop.eup %263 }
  0xa1   :  { %v158_v57 = vmul.f32 32.0, %v264_v56  ;;  %vm162_vm2 = vweird.f32 %v264_v56 }
  0xa2   :  { %v91_v38 = vmul.f32 0.5, %v89_v37 }
  0xa3   :  { %v159_v58 = vsub.f32 1.0, %v158_v57 }
  0xa4   :  { %v93_v39 = vmul.f32 %v91_v38, %v74_v24  ;;  %v258_v24 = vld [vmem:[%s423_s6] ss:$0 sm:$0xff]  ;;  %s222_s6 = sshll.u32 %s424_s7, 4  ;;  %s223_s6 = int_to_ptr.hbm [resolvable:$true] %s222_s6 }
  0xa5   :  { %v160_v59 = vmul.f32 %v264_v56, %v159_v58 }
  0xa6   :  { %237 = vmatmul.msk.f32.vlgmr.msra.gmra.mxu2 %vm104_vm1, %v93_v39 }
  0xa7   :  { %v161_v60 = vadd.f32 %v264_v56, %v160_v59 }
  0xa9   :  { %v163_v61 = vsel %vm162_vm2, %v264_v56, %v161_v60 }
 0x11d   :  { %v128_v41 = vpop.f32.mrf.mxu1 }
 0x11e   :  { %v134_v42 = vadd.f32 %v128_v41, %v94_v40 }
 0x120   :  { %136 = vst.msk [vmem:[#allocation2] sm:$0xff] %vm31_vm0, %v134_v42 }
 0x127   :  { %v141_v45 = vld [vmem:[#allocation2] sm:$0xff] }
 0x128   :  { %v147_v46 = vadd.f32 %v256_v43, %v141_v45 }
 0x129   :  { %v131_v47 = vpop.f32.mrf.mxu2 }
 0x12a   :  { %v135_v48 = vadd.f32 %v131_v47, %v95_v44  ;;  %v149_v49 = vadd.f32 %v147_v46, %v358_v6 }
 0x12c   :  { %137 = vst.msk [vmem:[#allocation2 + $0x8] sm:$0xff] %vm31_vm0, %v135_v48  ;;  %v151_v50 = vsel %vm31_vm0, %v149_v49, 0.0 }
 0x12d   :  { %152 = vadd.xlane.f32.xlu0 %v151_v50 }
 0x133   :  { %v142_v51 = vld [vmem:[#allocation2 + $0x8] sm:$0xff] }
 0x134   :  { %v148_v52 = vadd.f32 %v256_v43, %v142_v51 }
 0x136   :  { %v150_v53 = vadd.f32 %v148_v52, %v360_v7 }
 0x138   :  { %v154_v54 = vsel %vm31_vm0, %v150_v53, 0.0 }
 0x139   :  { %155 = vadd.xlane.f32.xlu0 %v154_v54 }
 0x1a0   :  { %v153_v62 = vpop.xlane.xlu0 %152 }
 0x1a1   :  { %v164_v63 = vmul.f32 %v163_v61, %v153_v62 }
 0x1a3   :  { %v166_v0 = vsub.f32 %v149_v49, %v164_v63 }
 0x1a5   :  { %v168_v1 = vmul.f32 %v166_v0, %v166_v0 }
 0x1a7   :  { %v170_v2 = vsel %vm31_vm0, %v168_v1, 0.0 }
 0x1a8   :  { %171 = vadd.xlane.f32.xlu1 %v170_v2 }
 0x1ac   :  { %v156_v3 = vpop.xlane.xlu0 %155 }
 0x1ad   :  { %v165_v4 = vmul.f32 %v163_v61, %v156_v3 }
 0x1af   :  { %v167_v5 = vsub.f32 %v150_v53, %v165_v4 }
 0x1b1   :  { %v169_v6 = vmul.f32 %v167_v5, %v167_v5 }
 0x1b3   :  { %v173_v7 = vsel %vm31_vm0, %v169_v6, 0.0 }
 0x1b4   :  { %174 = vadd.xlane.f32.xlu1 %v173_v7 }
 0x21b   :  { %v172_v8 = vpop.xlane.xlu1 %171 }
 0x21c   :  { %v176_v9 = vmul.f32 %v172_v8, %v163_v61 }
 0x21e   :  { %v178_v10 = vadd.f32 1e-05, %v176_v9 }
 0x220   :  { %265 = vrsqrt.f32 %v178_v10  ;;  %vm186_vm4 = vweird.f32 %v178_v10 }
 0x226   :  { %v266_v11 = vpop.eup %265 }
 0x227   :  { %v181_v12 = vmul.f32 %v266_v11, %v178_v10  ;;  %v175_v13 = vpop.xlane.xlu1 %174  ;;  %vm187_vm3 = vweird.f32 %v266_v11 }
 0x228   :  { %v177_v14 = vmul.f32 %v175_v13, %v163_v61  ;;  %vm188_vm5 = vmor %vm186_vm4, %vm187_vm3 }
 0x229   :  { %v182_v15 = vmul.f32 %v266_v11, %v181_v12 }
 0x22a   :  { %v179_v16 = vadd.f32 1e-05, %v177_v14 }
 0x22b   :  { %v183_v17 = vmul.f32 0.5, %v182_v15 }
 0x22c   :  { %267 = vrsqrt.f32 %v179_v16  ;;  %vm196_vm7 = vweird.f32 %v179_v16 }
 0x22d   :  { %v184_v18 = vsub.f32 1.5, %v183_v17 }
 0x22f   :  { %v185_v19 = vmul.f32 %v266_v11, %v184_v18 }
 0x231   :  { %v189_v21 = vsel %vm188_vm5, %v266_v11, %v185_v19 }
 0x232   :  { %v268_v22 = vpop.eup %267  ;;  %v200_v23 = vmul.f32 %v189_v21, %v166_v0 }
 0x233   :  { %v191_v25 = vmul.f32 %v268_v22, %v179_v16  ;;  %vm197_vm6 = vweird.f32 %v268_v22 }
 0x234   :  { %v206_v26 = vmul.f32 %v257_v20, %v200_v23  ;;  %vm198_vm8 = vmor %vm196_vm7, %vm197_vm6 }
 0x235   :  { %v192_v27 = vmul.f32 %v268_v22, %v191_v25 }
 0x236   :  { %v212_v28 = vadd.f32 %v258_v24, %v206_v26 }
 0x237   :  { %v193_v29 = vmul.f32 0.5, %v192_v27 }
 0x238   :  { %214 = vst.msk [vmem:[#allocation3] sm:$0xff] %vm31_vm0, %v212_v28 }
 0x239   :  { %v194_v30 = vsub.f32 1.5, %v193_v29 }
 0x23b   :  { %v195_v31 = vmul.f32 %v268_v22, %v194_v30 }
 0x23d   :  { %v199_v32 = vsel %vm198_vm8, %v268_v22, %v195_v31 }
 0x23e   :  { %v201_v33 = vmul.f32 %v199_v32, %v167_v5 }
 0x240   :  { %v207_v34 = vmul.f32 %v257_v20, %v201_v33 }
 0x242   :  { %v213_v35 = vadd.f32 %v258_v24, %v207_v34 }
 0x244   :  { %215 = vst.msk [vmem:[#allocation3 + $0x8] sm:$0xff] %vm31_vm0, %v213_v35 }
 0x245   :  { %228 = dma.vmem_to_hbm [thread:$0]  %s221_s9, 256, %s223_s6, [#allocation4], %s298_s12, %s298_s12, %s299_s0  }
 0x246   :  { %293 = dma.done.wait [#allocation4], 256  }
 0x247   :  { %294 = vsyncadd [#allocation4], 4294967040 }
 0x248   :  { %233 = vsyncpa [#allocation4], 1 }

</bundles_post_ra>
